<compile_context>
chip_gen: v6e
topology: v6e:2x2x1
jax: 0.10.0
libtpu: 0.0.40
codegen_flags: <defaults>
</compile_context>

<pallas_src>
import math
import functools

import jax
import jax.numpy as jnp
from jax.experimental import pallas as pl
from jax.experimental.pallas import tpu as pltpu

_INV_SQRT2 = 0.7071067811865476


def _block_kernel(
    x_ref,                       # (1, S, D) f32  -- full sequence for this batch elem
    ln1w_ref, ln1b_ref,          # (1, D) f32
    wq_ref, bq_ref,              # (D, D) bf16, (1, D) f32   (1/sqrt(hd) folded in)
    wk_ref, bk_ref,              # (D, D) bf16, (1, D) f32
    wv_ref, bv_ref,              # (D, D) bf16, (1, D) f32
    wo_ref, bo_ref,              # (D, D) bf16, (1, D) f32
    ln2w_ref, ln2b_ref,          # (1, D) f32
    w1_ref, b1_ref,              # (D, M) bf16, (1, M) f32
    w2_ref, b2_ref,              # (M, D) bf16, (1, D) f32
    o_ref,                       # (1, TQ, D)
    k_scr, v_scr,                # (S, D) bf16 scratch -- persist across q tiles
    ctx_scr,                     # (TQ, D) bf16 scratch -- packed per-head context
    *, H, TQ, eps):

    qi = pl.program_id(1)
    S = x_ref.shape[1]
    D = x_ref.shape[2]
    hd = D // H
    bf16 = jnp.bfloat16
    f32 = jnp.float32

    def layer_norm(x, w, b):
        mu = jnp.mean(x, axis=-1, keepdims=True)
        var = jnp.mean(jnp.square(x - mu), axis=-1, keepdims=True)
        return (x - mu) * jax.lax.rsqrt(var + eps) * w + b

    # ---- K / V projection for the whole sequence (chunked over S), once per b ----
    @pl.when(qi == 0)
    def _():
        def project_chunk(c, carry):
            start = pl.multiple_of(c * TQ, TQ)
            xc = x_ref[0, pl.ds(start, TQ), :]                              # (TQ, D) f32
            x1 = layer_norm(xc, ln1w_ref[0], ln1b_ref[0]).astype(bf16)
            k2d = jnp.dot(x1, wk_ref[...], preferred_element_type=f32) + bk_ref[0]
            v2d = jnp.dot(x1, wv_ref[...], preferred_element_type=f32) + bv_ref[0]
            k_scr[pl.ds(start, TQ), :] = k2d.astype(bf16)
            v_scr[pl.ds(start, TQ), :] = v2d.astype(bf16)
            return carry

        jax.lax.fori_loop(0, S // TQ, project_chunk, 0)

    # ---- LayerNorm 1 + Q projection for this query tile (sliced from resident x) ----
    q_start = pl.multiple_of(qi * TQ, TQ)
    xq = x_ref[0, pl.ds(q_start, TQ), :]                                    # (TQ, D) f32
    x1q = layer_norm(xq, ln1w_ref[0], ln1b_ref[0]).astype(bf16)
    q2d = (jnp.dot(x1q, wq_ref[...], preferred_element_type=f32)
           + bq_ref[0]).astype(bf16)                                        # (TQ, D), pre-scaled

    # ---- attention per head via static lane slices of the packed tensors ----
    for h in range(H):                      # static loop, H is small
        sl = slice(h * hd, (h + 1) * hd)
        q_h = q2d[:, sl]                                                    # (TQ, hd) bf16
        k_h = k_scr[:, sl]                                                  # (S,  hd) bf16
        v_h = v_scr[:, sl]                                                  # (S,  hd) bf16
        s = jax.lax.dot_general(q_h, k_h, (((1,), (1,)), ((), ())),
                                preferred_element_type=f32)                 # (TQ, S)
        s = s - jnp.max(s, axis=-1, keepdims=True)
        p = jnp.exp(s)
        # approx reciprocal: EUP path; ~1e-3 relative deviation from exact softmax
        p = p * pl.reciprocal(jnp.sum(p, axis=-1, keepdims=True), approx=True)
        ctx_scr[:, sl] = jnp.dot(p.astype(bf16), v_h,
                                 preferred_element_type=f32).astype(bf16)

    # ---- fused head-merge + output projection: one (TQ, D) x (D, D) matmul ----
    attn = jnp.dot(ctx_scr[...], wo_ref[...],
                   preferred_element_type=f32) + bo_ref[0]                  # (TQ, D)

    # ---- residual 1, LayerNorm 2, MLP (Linear -> exact GELU -> Linear), residual 2 ----
    x2 = xq + attn
    x3 = layer_norm(x2, ln2w_ref[0], ln2b_ref[0]).astype(bf16)
    h1 = jnp.dot(x3, w1_ref[...], preferred_element_type=f32) + b1_ref[0]   # (TQ, M)
    g = 0.5 * h1 * (1.0 + jax.lax.erf(h1 * _INV_SQRT2))
    h2 = jnp.dot(g.astype(bf16), w2_ref[...], preferred_element_type=f32) + b2_ref[0]
    o_ref[0] = (h2 + x2).astype(o_ref.dtype)


def _pick_tq(S):
    for t in (256, 128):
        if S % t == 0:
            return t
    return S   # TODO(synk): pad S to a multiple of 128 and mask instead.


def _vmem_limit_bytes(S, D, M, TQ, single_buffer):
    bf, f = 2, 4
    weights = (4 * D * D + 2 * D * M) * bf
    small = (10 * D + M) * f
    x_block = S * D * f
    out_block = TQ * D * f
    nbuf = 1 if single_buffer else 2
    static = nbuf * (weights + small + x_block) + 2 * out_block
    scratch = (2 * S * D + TQ * D) * bf
    acts = (6 * TQ * D + TQ * S + 2 * TQ * M) * f
    est = int((static + scratch + acts) * 1.3) + (2 << 20)
    try:
        cap = int(pltpu.get_tpu_info().vmem_capacity_bytes)
    except Exception:
        cap = 64 << 20
    return int(min(max(est, 16 << 20), cap - (4 << 20)))


def basic_transformer_block(x, params, *, n_heads):
    """x: (B, S, D) float32. params: dict of PyTorch-layout weights."""
    B, S, D = x.shape
    H = n_heads
    assert D % H == 0
    hd = D // H
    M = params["mlp_w1"].shape[0]
    scale = 1.0 / math.sqrt(hd)
    TQ = _pick_tq(S)
    n_qt = S // TQ

    bf16, f32 = jnp.bfloat16, jnp.float32
    row = lambda a: a.reshape(1, -1).astype(f32)

    args = (
        x,
        row(params["ln1_w"]), row(params["ln1_b"]),
        (params["in_proj_w"][0 * D:1 * D] * scale).T.astype(bf16),
        row(params["in_proj_b"][0 * D:1 * D] * scale),
        params["in_proj_w"][1 * D:2 * D].T.astype(bf16), row(params["in_proj_b"][1 * D:2 * D]),
        params["in_proj_w"][2 * D:3 * D].T.astype(bf16), row(params["in_proj_b"][2 * D:3 * D]),
        params["out_proj_w"].T.astype(bf16), row(params["out_proj_b"]),
        row(params["ln2_w"]), row(params["ln2_b"]),
        params["mlp_w1"].T.astype(bf16), row(params["mlp_b1"]),
        params["mlp_w2"].T.astype(bf16), row(params["mlp_b2"]),
    )

    def build(single_buffer):
        kernel = functools.partial(_block_kernel, H=H, TQ=TQ, eps=1e-5)

        def spec(shape, index_map):
            if single_buffer:
                return pl.BlockSpec(shape, index_map, pipeline_mode=pl.Buffered(1))
            return pl.BlockSpec(shape, index_map)

        def const(shape):
            return spec(shape, lambda b, qi: (0,) * len(shape))

        in_specs = [
            spec((1, S, D), lambda b, qi: (b, 0, 0)),        # x: full sequence per b
            const((1, D)), const((1, D)),                    # ln1 w, b
            const((D, D)), const((1, D)),                    # Wq (scaled), bq
            const((D, D)), const((1, D)),                    # Wk, bk
            const((D, D)), const((1, D)),                    # Wv, bv
            const((D, D)), const((1, D)),                    # Wo, bo
            const((1, D)), const((1, D)),                    # ln2 w, b
            const((D, M)), const((1, M)),                    # W1, b1
            const((M, D)), const((1, D)),                    # W2, b2
        ]
        return pl.pallas_call(
            kernel,
            out_shape=jax.ShapeDtypeStruct((B, S, D), x.dtype),
            grid_spec=pltpu.PrefetchScalarGridSpec(
                num_scalar_prefetch=0,
                grid=(B, n_qt),
                in_specs=in_specs,
                out_specs=pl.BlockSpec((1, TQ, D), lambda b, qi: (b, qi, 0)),
                scratch_shapes=[
                    pltpu.VMEM((S, D), bf16),    # K (packed lanes), reused across qi
                    pltpu.VMEM((S, D), bf16),    # V
                    pltpu.VMEM((TQ, D), bf16),   # packed per-head context
                ],
            ),
            compiler_params=pltpu.CompilerParams(
                # qi MUST stay "arbitrary" (sequential, qi==0 first): K/V scratch is
                # filled at qi==0 and reused by later query tiles of the same b.
                dimension_semantics=("parallel", "arbitrary"),
                vmem_limit_bytes=_vmem_limit_bytes(S, D, M, TQ, single_buffer),
            ),
        )

    # Prefer single-buffered grid-invariant inputs; fall back to default
    # double-buffering if this jax/libtpu build rejects pl.Buffered(1).
    try:
        return build(single_buffer=True)(*args)
    except Exception:
        return build(single_buffer=False)(*args)


def _reference(x, params, n_heads):
    """Pure-JAX reference matching the PyTorch module (f32)."""
    B, S, D = x.shape
    H = n_heads
    hd = D // H
    eps = 1e-5

    def ln(t, w, b):
        mu = t.mean(-1, keepdims=True)
        var = ((t - mu) ** 2).mean(-1, keepdims=True)
        return (t - mu) / jnp.sqrt(var + eps) * w + b

    x1 = ln(x, params["ln1_w"], params["ln1_b"])
    qkv = x1 @ params["in_proj_w"].T + params["in_proj_b"]
    q, k, v = jnp.split(qkv, 3, axis=-1)
    heads = lambda t: t.reshape(B, S, H, hd).transpose(0, 2, 1, 3)
    qh = heads(q) / math.sqrt(hd)
    kh, vh = heads(k), heads(v)
    p = jax.nn.softmax(jnp.einsum("bhqe,bhke->bhqk", qh, kh), axis=-1)
    ctx = jnp.einsum("bhqk,bhke->bhqe", p, vh).transpose(0, 2, 1, 3).reshape(B, S, D)
    attn = ctx @ params["out_proj_w"].T + params["out_proj_b"]
    x2 = x + attn
    x3 = ln(x2, params["ln2_w"], params["ln2_b"])
    h1 = x3 @ params["mlp_w1"].T + params["mlp_b1"]
    g = 0.5 * h1 * (1.0 + jax.lax.erf(h1 * _INV_SQRT2))
    return x2 + g @ params["mlp_w2"].T + params["mlp_b2"]


def init_params(key, D, mlp_size):
    ks = jax.random.split(key, 8)
    s = 0.02
    return {
        "ln1_w": jnp.ones((D,), jnp.float32),
        "ln1_b": jnp.zeros((D,), jnp.float32),
        "in_proj_w": s * jax.random.normal(ks[0], (3 * D, D), jnp.float32),
        "in_proj_b": s * jax.random.normal(ks[1], (3 * D,), jnp.float32),
        "out_proj_w": s * jax.random.normal(ks[2], (D, D), jnp.float32),
        "out_proj_b": s * jax.random.normal(ks[3], (D,), jnp.float32),
        "ln2_w": jnp.ones((D,), jnp.float32),
        "ln2_b": jnp.zeros((D,), jnp.float32),
        "mlp_w1": s * jax.random.normal(ks[4], (mlp_size, D), jnp.float32),
        "mlp_b1": s * jax.random.normal(ks[5], (mlp_size,), jnp.float32),
        "mlp_w2": s * jax.random.normal(ks[6], (D, mlp_size), jnp.float32),
        "mlp_b2": s * jax.random.normal(ks[7], (D,), jnp.float32),
    }


if __name__ == "__main__":
    B, S, D, H, M = 2, 8, 32, 4, 64
    key = jax.random.PRNGKey(0)
    k_x, k_p = jax.random.split(key)
    x = jax.random.normal(k_x, (B, S, D), jnp.float32)
    params = init_params(k_p, D, M)

    out = basic_transformer_block(x, params, n_heads=H)
    out = jax.block_until_ready(out)
    assert out.shape == (B, S, D)

    ref = _reference(x, params, H)
    err = float(jnp.max(jnp.abs(out - ref)))
    assert err < 5e-2, f"max abs error too large: {err}"
    print("KERNEL_OK")
</pallas_src>

<mosaic_0001>
module attributes {stable_mosaic.version = 11 : i64} {
  func.func @_block_kernel(%arg0: i32, %arg1: i32, %arg2: memref<1x8x32xf32, #tpu.memory_space<vmem>>, %arg3: memref<1x32xf32, #tpu.memory_space<vmem>>, %arg4: memref<1x32xf32, #tpu.memory_space<vmem>>, %arg5: memref<32x32xbf16, #tpu.memory_space<vmem>>, %arg6: memref<1x32xf32, #tpu.memory_space<vmem>>, %arg7: memref<32x32xbf16, #tpu.memory_space<vmem>>, %arg8: memref<1x32xf32, #tpu.memory_space<vmem>>, %arg9: memref<32x32xbf16, #tpu.memory_space<vmem>>, %arg10: memref<1x32xf32, #tpu.memory_space<vmem>>, %arg11: memref<32x32xbf16, #tpu.memory_space<vmem>>, %arg12: memref<1x32xf32, #tpu.memory_space<vmem>>, %arg13: memref<1x32xf32, #tpu.memory_space<vmem>>, %arg14: memref<1x32xf32, #tpu.memory_space<vmem>>, %arg15: memref<32x64xbf16, #tpu.memory_space<vmem>>, %arg16: memref<1x64xf32, #tpu.memory_space<vmem>>, %arg17: memref<64x32xbf16, #tpu.memory_space<vmem>>, %arg18: memref<1x32xf32, #tpu.memory_space<vmem>>, %arg19: memref<1x8x32xf32, #tpu.memory_space<vmem>>, %arg20: memref<8x32xbf16, #tpu.memory_space<vmem>>, %arg21: memref<8x32xbf16, #tpu.memory_space<vmem>>, %arg22: memref<8x32xbf16, #tpu.memory_space<vmem>>) attributes {dimension_semantics = [#tpu.dimension_semantics<parallel>, #tpu.dimension_semantics<arbitrary>], iteration_bounds = array<i64: 2, 1>, scalar_prefetch = 0 : i64, scratch_operands = 3 : i64, tpu.core_type = #tpu.core_type<tc>, window_params = [{pipeline_mode = #tpu.pipeline_mode<synchronous>, transform_indices = @transform_0, window_bounds = array<i64: 1, 8, 32>}, {pipeline_mode = #tpu.pipeline_mode<synchronous>, transform_indices = @transform_1, window_bounds = array<i64: 1, 32>}, {pipeline_mode = #tpu.pipeline_mode<synchronous>, transform_indices = @transform_2, window_bounds = array<i64: 1, 32>}, {pipeline_mode = #tpu.pipeline_mode<synchronous>, transform_indices = @transform_3, window_bounds = array<i64: 32, 32>}, {pipeline_mode = #tpu.pipeline_mode<synchronous>, transform_indices = @transform_4, window_bounds = array<i64: 1, 32>}, {pipeline_mode = #tpu.pipeline_mode<synchronous>, transform_indices = @transform_5, window_bounds = array<i64: 32, 32>}, {pipeline_mode = #tpu.pipeline_mode<synchronous>, transform_indices = @transform_6, window_bounds = array<i64: 1, 32>}, {pipeline_mode = #tpu.pipeline_mode<synchronous>, transform_indices = @transform_7, window_bounds = array<i64: 32, 32>}, {pipeline_mode = #tpu.pipeline_mode<synchronous>, transform_indices = @transform_8, window_bounds = array<i64: 1, 32>}, {pipeline_mode = #tpu.pipeline_mode<synchronous>, transform_indices = @transform_9, window_bounds = array<i64: 32, 32>}, {pipeline_mode = #tpu.pipeline_mode<synchronous>, transform_indices = @transform_10, window_bounds = array<i64: 1, 32>}, {pipeline_mode = #tpu.pipeline_mode<synchronous>, transform_indices = @transform_11, window_bounds = array<i64: 1, 32>}, {pipeline_mode = #tpu.pipeline_mode<synchronous>, transform_indices = @transform_12, window_bounds = array<i64: 1, 32>}, {pipeline_mode = #tpu.pipeline_mode<synchronous>, transform_indices = @transform_13, window_bounds = array<i64: 32, 64>}, {pipeline_mode = #tpu.pipeline_mode<synchronous>, transform_indices = @transform_14, window_bounds = array<i64: 1, 64>}, {pipeline_mode = #tpu.pipeline_mode<synchronous>, transform_indices = @transform_15, window_bounds = array<i64: 64, 32>}, {pipeline_mode = #tpu.pipeline_mode<synchronous>, transform_indices = @transform_16, window_bounds = array<i64: 1, 32>}, {transform_indices = @transform_17, window_bounds = array<i64: 1, 8, 32>}]} {
    %c0_i32 = arith.constant 0 : i32
    %0 = arith.cmpi eq, %arg1, %c0_i32 : i32
    %1 = arith.extui %0 : i1 to i32
    %c0_i32_0 = arith.constant 0 : i32
    %2 = arith.cmpi ne, %1, %c0_i32_0 : i32
    scf.if %2 {
      %c0_i32_84 = arith.constant 0 : i32
      %c8_i32_85 = arith.constant 8 : i32
      %182 = arith.muli %c0_i32_84, %c8_i32_85 : i32
      %183 = tpu.assume_multiple %182, 8 : i32
      %c0_86 = arith.constant 0 : index
      %184 = arith.index_cast %183 : i32 to index
      %c0_87 = arith.constant 0 : index
      %185 = vector.load %arg2[%c0_86, %184, %c0_87] : memref<1x8x32xf32, #tpu.memory_space<vmem>>, vector<1x8x32xf32>
      %186 = vector.shape_cast %185 : vector<1x8x32xf32> to vector<8x32xf32>
      %c0_88 = arith.constant 0 : index
      %c0_89 = arith.constant 0 : index
      %187 = vector.load %arg3[%c0_88, %c0_89] : memref<1x32xf32, #tpu.memory_space<vmem>>, vector<1x32xf32>
      %188 = vector.shape_cast %187 : vector<1x32xf32> to vector<32xf32>
      %c0_90 = arith.constant 0 : index
      %c0_91 = arith.constant 0 : index
      %189 = vector.load %arg4[%c0_90, %c0_91] : memref<1x32xf32, #tpu.memory_space<vmem>>, vector<1x32xf32>
      %190 = vector.shape_cast %189 : vector<1x32xf32> to vector<32xf32>
      %cst_92 = arith.constant dense<0.000000e+00> : vector<8xf32>
      %191 = vector.multi_reduction <add>, %186, %cst_92 [1] : vector<8x32xf32> to vector<8xf32>
      %192 = vector.shape_cast %191 : vector<8xf32> to vector<8x1xf32>
      %cst_93 = arith.constant 3.200000e+01 : f32
      %193 = vector.broadcast %cst_93 : f32 to vector<8x1xf32>
      %194 = arith.divf %192, %193 : vector<8x1xf32>
      %195 = vector.broadcast %194 : vector<8x1xf32> to vector<8x32xf32>
      %196 = arith.subf %186, %195 : vector<8x32xf32>
      %197 = arith.mulf %196, %196 : vector<8x32xf32>
      %cst_94 = arith.constant dense<0.000000e+00> : vector<8xf32>
      %198 = vector.multi_reduction <add>, %197, %cst_94 [1] : vector<8x32xf32> to vector<8xf32>
      %199 = vector.shape_cast %198 : vector<8xf32> to vector<8x1xf32>
      %cst_95 = arith.constant 3.200000e+01 : f32
      %200 = vector.broadcast %cst_95 : f32 to vector<8x1xf32>
      %201 = arith.divf %199, %200 : vector<8x1xf32>
      %202 = vector.broadcast %194 : vector<8x1xf32> to vector<8x32xf32>
      %203 = arith.subf %186, %202 : vector<8x32xf32>
      %cst_96 = arith.constant 9.99999974E-6 : f32
      %204 = vector.broadcast %cst_96 : f32 to vector<8x1xf32>
      %205 = arith.addf %201, %204 : vector<8x1xf32>
      %206 = math.rsqrt %205 : vector<8x1xf32>
      %207 = vector.broadcast %206 : vector<8x1xf32> to vector<8x32xf32>
      %208 = arith.mulf %203, %207 : vector<8x32xf32>
      %209 = vector.shape_cast %188 : vector<32xf32> to vector<1x32xf32>
      %210 = vector.broadcast %209 : vector<1x32xf32> to vector<8x32xf32>
      %211 = arith.mulf %208, %210 : vector<8x32xf32>
      %212 = vector.shape_cast %190 : vector<32xf32> to vector<1x32xf32>
      %213 = vector.broadcast %212 : vector<1x32xf32> to vector<8x32xf32>
      %214 = arith.addf %211, %213 : vector<8x32xf32>
      %215 = arith.truncf %214 : vector<8x32xf32> to vector<8x32xbf16>
      %c0_97 = arith.constant 0 : index
      %c0_98 = arith.constant 0 : index
      %216 = vector.load %arg7[%c0_97, %c0_98] : memref<32x32xbf16, #tpu.memory_space<vmem>>, vector<32x32xbf16>
      %cst_99 = arith.constant dense<0.000000e+00> : vector<8x32xf32>
      %217 = tpu.matmul %215, %216, %cst_99 {dimension_numbers = #tpu.dot_dimension_numbers<[1], [0], [0], [1], [0, 0, 1, 1], [], []>} : vector<8x32xbf16>, vector<32x32xbf16>, vector<8x32xf32> -> vector<8x32xf32>
      %c0_100 = arith.constant 0 : index
      %c0_101 = arith.constant 0 : index
      %218 = vector.load %arg8[%c0_100, %c0_101] : memref<1x32xf32, #tpu.memory_space<vmem>>, vector<1x32xf32>
      %219 = vector.shape_cast %218 : vector<1x32xf32> to vector<32xf32>
      %220 = vector.shape_cast %219 : vector<32xf32> to vector<1x32xf32>
      %221 = vector.broadcast %220 : vector<1x32xf32> to vector<8x32xf32>
      %222 = arith.addf %217, %221 : vector<8x32xf32>
      %c0_102 = arith.constant 0 : index
      %c0_103 = arith.constant 0 : index
      %223 = vector.load %arg9[%c0_102, %c0_103] : memref<32x32xbf16, #tpu.memory_space<vmem>>, vector<32x32xbf16>
      %cst_104 = arith.constant dense<0.000000e+00> : vector<8x32xf32>
      %224 = tpu.matmul %215, %223, %cst_104 {dimension_numbers = #tpu.dot_dimension_numbers<[1], [0], [0], [1], [0, 0, 1, 1], [], []>} : vector<8x32xbf16>, vector<32x32xbf16>, vector<8x32xf32> -> vector<8x32xf32>
      %c0_105 = arith.constant 0 : index
      %c0_106 = arith.constant 0 : index
      %225 = vector.load %arg10[%c0_105, %c0_106] : memref<1x32xf32, #tpu.memory_space<vmem>>, vector<1x32xf32>
      %226 = vector.shape_cast %225 : vector<1x32xf32> to vector<32xf32>
      %227 = vector.shape_cast %226 : vector<32xf32> to vector<1x32xf32>
      %228 = vector.broadcast %227 : vector<1x32xf32> to vector<8x32xf32>
      %229 = arith.addf %224, %228 : vector<8x32xf32>
      %230 = arith.truncf %222 : vector<8x32xf32> to vector<8x32xbf16>
      %231 = arith.index_cast %183 : i32 to index
      %c0_107 = arith.constant 0 : index
      %232 = vector.load %arg20[%231, %c0_107] : memref<8x32xbf16, #tpu.memory_space<vmem>>, vector<8x32xbf16>
      tpu.vector_store %arg20[%231, %c0_107], %230 {strides = array<i32>} : memref<8x32xbf16, #tpu.memory_space<vmem>>, vector<8x32xbf16>,
      %233 = arith.truncf %229 : vector<8x32xf32> to vector<8x32xbf16>
      %234 = arith.index_cast %183 : i32 to index
      %c0_108 = arith.constant 0 : index
      %235 = vector.load %arg21[%234, %c0_108] : memref<8x32xbf16, #tpu.memory_space<vmem>>, vector<8x32xbf16>
      tpu.vector_store %arg21[%234, %c0_108], %233 {strides = array<i32>} : memref<8x32xbf16, #tpu.memory_space<vmem>>, vector<8x32xbf16>,
      %c1_i32 = arith.constant 1 : i32
    } else {
    }
    %c8_i32 = arith.constant 8 : i32
    %3 = arith.muli %arg1, %c8_i32 : i32
    %4 = tpu.assume_multiple %3, 8 : i32
    %c0 = arith.constant 0 : index
    %5 = arith.index_cast %4 : i32 to index
    %c0_1 = arith.constant 0 : index
    %6 = vector.load %arg2[%c0, %5, %c0_1] : memref<1x8x32xf32, #tpu.memory_space<vmem>>, vector<1x8x32xf32>
    %7 = vector.shape_cast %6 : vector<1x8x32xf32> to vector<8x32xf32>
    %c0_2 = arith.constant 0 : index
    %c0_3 = arith.constant 0 : index
    %8 = vector.load %arg3[%c0_2, %c0_3] : memref<1x32xf32, #tpu.memory_space<vmem>>, vector<1x32xf32>
    %9 = vector.shape_cast %8 : vector<1x32xf32> to vector<32xf32>
    %c0_4 = arith.constant 0 : index
    %c0_5 = arith.constant 0 : index
    %10 = vector.load %arg4[%c0_4, %c0_5] : memref<1x32xf32, #tpu.memory_space<vmem>>, vector<1x32xf32>
    %11 = vector.shape_cast %10 : vector<1x32xf32> to vector<32xf32>
    %cst = arith.constant dense<0.000000e+00> : vector<8xf32>
    %12 = vector.multi_reduction <add>, %7, %cst [1] : vector<8x32xf32> to vector<8xf32>
    %13 = vector.shape_cast %12 : vector<8xf32> to vector<8x1xf32>
    %cst_6 = arith.constant 3.200000e+01 : f32
    %14 = vector.broadcast %cst_6 : f32 to vector<8x1xf32>
    %15 = arith.divf %13, %14 : vector<8x1xf32>
    %16 = vector.broadcast %15 : vector<8x1xf32> to vector<8x32xf32>
    %17 = arith.subf %7, %16 : vector<8x32xf32>
    %18 = arith.mulf %17, %17 : vector<8x32xf32>
    %cst_7 = arith.constant dense<0.000000e+00> : vector<8xf32>
    %19 = vector.multi_reduction <add>, %18, %cst_7 [1] : vector<8x32xf32> to vector<8xf32>
    %20 = vector.shape_cast %19 : vector<8xf32> to vector<8x1xf32>
    %cst_8 = arith.constant 3.200000e+01 : f32
    %21 = vector.broadcast %cst_8 : f32 to vector<8x1xf32>
    %22 = arith.divf %20, %21 : vector<8x1xf32>
    %23 = vector.broadcast %15 : vector<8x1xf32> to vector<8x32xf32>
    %24 = arith.subf %7, %23 : vector<8x32xf32>
    %cst_9 = arith.constant 9.99999974E-6 : f32
    %25 = vector.broadcast %cst_9 : f32 to vector<8x1xf32>
    %26 = arith.addf %22, %25 : vector<8x1xf32>
    %27 = math.rsqrt %26 : vector<8x1xf32>
    %28 = vector.broadcast %27 : vector<8x1xf32> to vector<8x32xf32>
    %29 = arith.mulf %24, %28 : vector<8x32xf32>
    %30 = vector.shape_cast %9 : vector<32xf32> to vector<1x32xf32>
    %31 = vector.broadcast %30 : vector<1x32xf32> to vector<8x32xf32>
    %32 = arith.mulf %29, %31 : vector<8x32xf32>
    %33 = vector.shape_cast %11 : vector<32xf32> to vector<1x32xf32>
    %34 = vector.broadcast %33 : vector<1x32xf32> to vector<8x32xf32>
    %35 = arith.addf %32, %34 : vector<8x32xf32>
    %36 = arith.truncf %35 : vector<8x32xf32> to vector<8x32xbf16>
    %c0_10 = arith.constant 0 : index
    %c0_11 = arith.constant 0 : index
    %37 = vector.load %arg5[%c0_10, %c0_11] : memref<32x32xbf16, #tpu.memory_space<vmem>>, vector<32x32xbf16>
    %cst_12 = arith.constant dense<0.000000e+00> : vector<8x32xf32>
    %38 = tpu.matmul %36, %37, %cst_12 {dimension_numbers = #tpu.dot_dimension_numbers<[1], [0], [0], [1], [0, 0, 1, 1], [], []>} : vector<8x32xbf16>, vector<32x32xbf16>, vector<8x32xf32> -> vector<8x32xf32>
    %c0_13 = arith.constant 0 : index
    %c0_14 = arith.constant 0 : index
    %39 = vector.load %arg6[%c0_13, %c0_14] : memref<1x32xf32, #tpu.memory_space<vmem>>, vector<1x32xf32>
    %40 = vector.shape_cast %39 : vector<1x32xf32> to vector<32xf32>
    %41 = vector.shape_cast %40 : vector<32xf32> to vector<1x32xf32>
    %42 = vector.broadcast %41 : vector<1x32xf32> to vector<8x32xf32>
    %43 = arith.addf %38, %42 : vector<8x32xf32>
    %44 = arith.truncf %43 : vector<8x32xf32> to vector<8x32xbf16>
    %45 = vector.extract_strided_slice %44 {offsets = [0, 0], sizes = [8, 8], strides = [1, 1]} : vector<8x32xbf16> to vector<8x8xbf16>
    %c0_15 = arith.constant 0 : index
    %c0_16 = arith.constant 0 : index
    %46 = vector.load %arg20[%c0_15, %c0_16] : memref<8x32xbf16, #tpu.memory_space<vmem>>, vector<8x8xbf16>
    %c0_17 = arith.constant 0 : index
    %c0_18 = arith.constant 0 : index
    %47 = vector.load %arg21[%c0_17, %c0_18] : memref<8x32xbf16, #tpu.memory_space<vmem>>, vector<8x8xbf16>
    %cst_19 = arith.constant dense<0.000000e+00> : vector<8x8xf32>
    %48 = tpu.matmul %45, %46, %cst_19 {dimension_numbers = #tpu.dot_dimension_numbers<[1], [1], [0], [0], [0, 0, 1, 0], [], []>} : vector<8x8xbf16>, vector<8x8xbf16>, vector<8x8xf32> -> vector<8x8xf32>
    %cst_20 = arith.constant dense<0xFF800000> : vector<8xf32>
    %49 = vector.multi_reduction <maximumf>, %48, %cst_20 [1] : vector<8x8xf32> to vector<8xf32>
    %50 = vector.shape_cast %49 : vector<8xf32> to vector<8x1xf32>
    %51 = vector.broadcast %50 : vector<8x1xf32> to vector<8x8xf32>
    %52 = arith.subf %48, %51 : vector<8x8xf32>
    %53 = math.exp %52 : vector<8x8xf32>
    %cst_21 = arith.constant dense<0.000000e+00> : vector<8xf32>
    %54 = vector.multi_reduction <add>, %53, %cst_21 [1] : vector<8x8xf32> to vector<8xf32>
    %55 = vector.shape_cast %54 : vector<8xf32> to vector<8x1xf32>
    %56 = tpu.reciprocal %55 {approx = true} : vector<8x1xf32> -> vector<8x1xf32>
    %57 = vector.broadcast %56 : vector<8x1xf32> to vector<8x8xf32>
    %58 = arith.mulf %53, %57 : vector<8x8xf32>
    %59 = arith.truncf %58 : vector<8x8xf32> to vector<8x8xbf16>
    %cst_22 = arith.constant dense<0.000000e+00> : vector<8x8xf32>
    %60 = tpu.matmul %59, %47, %cst_22 {dimension_numbers = #tpu.dot_dimension_numbers<[1], [0], [0], [1], [0, 0, 1, 1], [], []>} : vector<8x8xbf16>, vector<8x8xbf16>, vector<8x8xf32> -> vector<8x8xf32>
    %61 = arith.truncf %60 : vector<8x8xf32> to vector<8x8xbf16>
    %c0_23 = arith.constant 0 : index
    %c0_24 = arith.constant 0 : index
    %62 = vector.load %arg22[%c0_23, %c0_24] : memref<8x32xbf16, #tpu.memory_space<vmem>>, vector<8x8xbf16>
    tpu.vector_store %arg22[%c0_23, %c0_24], %61 {strides = array<i32>} : memref<8x32xbf16, #tpu.memory_space<vmem>>, vector<8x8xbf16>,
    %63 = vector.extract_strided_slice %44 {offsets = [0, 8], sizes = [8, 8], strides = [1, 1]} : vector<8x32xbf16> to vector<8x8xbf16>
    %c0_25 = arith.constant 0 : index
    %c8 = arith.constant 8 : index
    %64 = vector.load %arg20[%c0_25, %c8] : memref<8x32xbf16, #tpu.memory_space<vmem>>, vector<8x8xbf16>
    %c0_26 = arith.constant 0 : index
    %c8_27 = arith.constant 8 : index
    %65 = vector.load %arg21[%c0_26, %c8_27] : memref<8x32xbf16, #tpu.memory_space<vmem>>, vector<8x8xbf16>
    %cst_28 = arith.constant dense<0.000000e+00> : vector<8x8xf32>
    %66 = tpu.matmul %63, %64, %cst_28 {dimension_numbers = #tpu.dot_dimension_numbers<[1], [1], [0], [0], [0, 0, 1, 0], [], []>} : vector<8x8xbf16>, vector<8x8xbf16>, vector<8x8xf32> -> vector<8x8xf32>
    %cst_29 = arith.constant dense<0xFF800000> : vector<8xf32>
    %67 = vector.multi_reduction <maximumf>, %66, %cst_29 [1] : vector<8x8xf32> to vector<8xf32>
    %68 = vector.shape_cast %67 : vector<8xf32> to vector<8x1xf32>
    %69 = vector.broadcast %68 : vector<8x1xf32> to vector<8x8xf32>
    %70 = arith.subf %66, %69 : vector<8x8xf32>
    %71 = math.exp %70 : vector<8x8xf32>
    %cst_30 = arith.constant dense<0.000000e+00> : vector<8xf32>
    %72 = vector.multi_reduction <add>, %71, %cst_30 [1] : vector<8x8xf32> to vector<8xf32>
    %73 = vector.shape_cast %72 : vector<8xf32> to vector<8x1xf32>
    %74 = tpu.reciprocal %73 {approx = true} : vector<8x1xf32> -> vector<8x1xf32>
    %75 = vector.broadcast %74 : vector<8x1xf32> to vector<8x8xf32>
    %76 = arith.mulf %71, %75 : vector<8x8xf32>
    %77 = arith.truncf %76 : vector<8x8xf32> to vector<8x8xbf16>
    %cst_31 = arith.constant dense<0.000000e+00> : vector<8x8xf32>
    %78 = tpu.matmul %77, %65, %cst_31 {dimension_numbers = #tpu.dot_dimension_numbers<[1], [0], [0], [1], [0, 0, 1, 1], [], []>} : vector<8x8xbf16>, vector<8x8xbf16>, vector<8x8xf32> -> vector<8x8xf32>
    %79 = arith.truncf %78 : vector<8x8xf32> to vector<8x8xbf16>
    %c0_32 = arith.constant 0 : index
    %c8_33 = arith.constant 8 : index
    %80 = vector.load %arg22[%c0_32, %c8_33] : memref<8x32xbf16, #tpu.memory_space<vmem>>, vector<8x8xbf16>
    tpu.vector_store %arg22[%c0_32, %c8_33], %79 {strides = array<i32>} : memref<8x32xbf16, #tpu.memory_space<vmem>>, vector<8x8xbf16>,
    %81 = vector.extract_strided_slice %44 {offsets = [0, 16], sizes = [8, 8], strides = [1, 1]} : vector<8x32xbf16> to vector<8x8xbf16>
    %c0_34 = arith.constant 0 : index
    %c16 = arith.constant 16 : index
    %82 = vector.load %arg20[%c0_34, %c16] : memref<8x32xbf16, #tpu.memory_space<vmem>>, vector<8x8xbf16>
    %c0_35 = arith.constant 0 : index
    %c16_36 = arith.constant 16 : index
    %83 = vector.load %arg21[%c0_35, %c16_36] : memref<8x32xbf16, #tpu.memory_space<vmem>>, vector<8x8xbf16>
    %cst_37 = arith.constant dense<0.000000e+00> : vector<8x8xf32>
    %84 = tpu.matmul %81, %82, %cst_37 {dimension_numbers = #tpu.dot_dimension_numbers<[1], [1], [0], [0], [0, 0, 1, 0], [], []>} : vector<8x8xbf16>, vector<8x8xbf16>, vector<8x8xf32> -> vector<8x8xf32>
    %cst_38 = arith.constant dense<0xFF800000> : vector<8xf32>
    %85 = vector.multi_reduction <maximumf>, %84, %cst_38 [1] : vector<8x8xf32> to vector<8xf32>
    %86 = vector.shape_cast %85 : vector<8xf32> to vector<8x1xf32>
    %87 = vector.broadcast %86 : vector<8x1xf32> to vector<8x8xf32>
    %88 = arith.subf %84, %87 : vector<8x8xf32>
    %89 = math.exp %88 : vector<8x8xf32>
    %cst_39 = arith.constant dense<0.000000e+00> : vector<8xf32>
    %90 = vector.multi_reduction <add>, %89, %cst_39 [1] : vector<8x8xf32> to vector<8xf32>
    %91 = vector.shape_cast %90 : vector<8xf32> to vector<8x1xf32>
    %92 = tpu.reciprocal %91 {approx = true} : vector<8x1xf32> -> vector<8x1xf32>
    %93 = vector.broadcast %92 : vector<8x1xf32> to vector<8x8xf32>
    %94 = arith.mulf %89, %93 : vector<8x8xf32>
    %95 = arith.truncf %94 : vector<8x8xf32> to vector<8x8xbf16>
    %cst_40 = arith.constant dense<0.000000e+00> : vector<8x8xf32>
    %96 = tpu.matmul %95, %83, %cst_40 {dimension_numbers = #tpu.dot_dimension_numbers<[1], [0], [0], [1], [0, 0, 1, 1], [], []>} : vector<8x8xbf16>, vector<8x8xbf16>, vector<8x8xf32> -> vector<8x8xf32>
    %97 = arith.truncf %96 : vector<8x8xf32> to vector<8x8xbf16>
    %c0_41 = arith.constant 0 : index
    %c16_42 = arith.constant 16 : index
    %98 = vector.load %arg22[%c0_41, %c16_42] : memref<8x32xbf16, #tpu.memory_space<vmem>>, vector<8x8xbf16>
    tpu.vector_store %arg22[%c0_41, %c16_42], %97 {strides = array<i32>} : memref<8x32xbf16, #tpu.memory_space<vmem>>, vector<8x8xbf16>,
    %99 = vector.extract_strided_slice %44 {offsets = [0, 24], sizes = [8, 8], strides = [1, 1]} : vector<8x32xbf16> to vector<8x8xbf16>
    %c0_43 = arith.constant 0 : index
    %c24 = arith.constant 24 : index
    %100 = vector.load %arg20[%c0_43, %c24] : memref<8x32xbf16, #tpu.memory_space<vmem>>, vector<8x8xbf16>
    %c0_44 = arith.constant 0 : index
    %c24_45 = arith.constant 24 : index
    %101 = vector.load %arg21[%c0_44, %c24_45] : memref<8x32xbf16, #tpu.memory_space<vmem>>, vector<8x8xbf16>
    %cst_46 = arith.constant dense<0.000000e+00> : vector<8x8xf32>
    %102 = tpu.matmul %99, %100, %cst_46 {dimension_numbers = #tpu.dot_dimension_numbers<[1], [1], [0], [0], [0, 0, 1, 0], [], []>} : vector<8x8xbf16>, vector<8x8xbf16>, vector<8x8xf32> -> vector<8x8xf32>
    %cst_47 = arith.constant dense<0xFF800000> : vector<8xf32>
    %103 = vector.multi_reduction <maximumf>, %102, %cst_47 [1] : vector<8x8xf32> to vector<8xf32>
    %104 = vector.shape_cast %103 : vector<8xf32> to vector<8x1xf32>
    %105 = vector.broadcast %104 : vector<8x1xf32> to vector<8x8xf32>
    %106 = arith.subf %102, %105 : vector<8x8xf32>
    %107 = math.exp %106 : vector<8x8xf32>
    %cst_48 = arith.constant dense<0.000000e+00> : vector<8xf32>
    %108 = vector.multi_reduction <add>, %107, %cst_48 [1] : vector<8x8xf32> to vector<8xf32>
    %109 = vector.shape_cast %108 : vector<8xf32> to vector<8x1xf32>
    %110 = tpu.reciprocal %109 {approx = true} : vector<8x1xf32> -> vector<8x1xf32>
    %111 = vector.broadcast %110 : vector<8x1xf32> to vector<8x8xf32>
    %112 = arith.mulf %107, %111 : vector<8x8xf32>
    %113 = arith.truncf %112 : vector<8x8xf32> to vector<8x8xbf16>
    %cst_49 = arith.constant dense<0.000000e+00> : vector<8x8xf32>
    %114 = tpu.matmul %113, %101, %cst_49 {dimension_numbers = #tpu.dot_dimension_numbers<[1], [0], [0], [1], [0, 0, 1, 1], [], []>} : vector<8x8xbf16>, vector<8x8xbf16>, vector<8x8xf32> -> vector<8x8xf32>
    %115 = arith.truncf %114 : vector<8x8xf32> to vector<8x8xbf16>
    %c0_50 = arith.constant 0 : index
    %c24_51 = arith.constant 24 : index
    %116 = vector.load %arg22[%c0_50, %c24_51] : memref<8x32xbf16, #tpu.memory_space<vmem>>, vector<8x8xbf16>
    tpu.vector_store %arg22[%c0_50, %c24_51], %115 {strides = array<i32>} : memref<8x32xbf16, #tpu.memory_space<vmem>>, vector<8x8xbf16>,
    %c0_52 = arith.constant 0 : index
    %c0_53 = arith.constant 0 : index
    %117 = vector.load %arg22[%c0_52, %c0_53] : memref<8x32xbf16, #tpu.memory_space<vmem>>, vector<8x32xbf16>
    %c0_54 = arith.constant 0 : index
    %c0_55 = arith.constant 0 : index
    %118 = vector.load %arg11[%c0_54, %c0_55] : memref<32x32xbf16, #tpu.memory_space<vmem>>, vector<32x32xbf16>
    %cst_56 = arith.constant dense<0.000000e+00> : vector<8x32xf32>
    %119 = tpu.matmul %117, %118, %cst_56 {dimension_numbers = #tpu.dot_dimension_numbers<[1], [0], [0], [1], [0, 0, 1, 1], [], []>} : vector<8x32xbf16>, vector<32x32xbf16>, vector<8x32xf32> -> vector<8x32xf32>
    %c0_57 = arith.constant 0 : index
    %c0_58 = arith.constant 0 : index
    %120 = vector.load %arg12[%c0_57, %c0_58] : memref<1x32xf32, #tpu.memory_space<vmem>>, vector<1x32xf32>
    %121 = vector.shape_cast %120 : vector<1x32xf32> to vector<32xf32>
    %122 = vector.shape_cast %121 : vector<32xf32> to vector<1x32xf32>
    %123 = vector.broadcast %122 : vector<1x32xf32> to vector<8x32xf32>
    %124 = arith.addf %119, %123 : vector<8x32xf32>
    %125 = arith.addf %7, %124 : vector<8x32xf32>
    %c0_59 = arith.constant 0 : index
    %c0_60 = arith.constant 0 : index
    %126 = vector.load %arg13[%c0_59, %c0_60] : memref<1x32xf32, #tpu.memory_space<vmem>>, vector<1x32xf32>
    %127 = vector.shape_cast %126 : vector<1x32xf32> to vector<32xf32>
    %c0_61 = arith.constant 0 : index
    %c0_62 = arith.constant 0 : index
    %128 = vector.load %arg14[%c0_61, %c0_62] : memref<1x32xf32, #tpu.memory_space<vmem>>, vector<1x32xf32>
    %129 = vector.shape_cast %128 : vector<1x32xf32> to vector<32xf32>
    %cst_63 = arith.constant dense<0.000000e+00> : vector<8xf32>
    %130 = vector.multi_reduction <add>, %125, %cst_63 [1] : vector<8x32xf32> to vector<8xf32>
    %131 = vector.shape_cast %130 : vector<8xf32> to vector<8x1xf32>
    %cst_64 = arith.constant 3.200000e+01 : f32
    %132 = vector.broadcast %cst_64 : f32 to vector<8x1xf32>
    %133 = arith.divf %131, %132 : vector<8x1xf32>
    %134 = vector.broadcast %133 : vector<8x1xf32> to vector<8x32xf32>
    %135 = arith.subf %125, %134 : vector<8x32xf32>
    %136 = arith.mulf %135, %135 : vector<8x32xf32>
    %cst_65 = arith.constant dense<0.000000e+00> : vector<8xf32>
    %137 = vector.multi_reduction <add>, %136, %cst_65 [1] : vector<8x32xf32> to vector<8xf32>
    %138 = vector.shape_cast %137 : vector<8xf32> to vector<8x1xf32>
    %cst_66 = arith.constant 3.200000e+01 : f32
    %139 = vector.broadcast %cst_66 : f32 to vector<8x1xf32>
    %140 = arith.divf %138, %139 : vector<8x1xf32>
    %141 = vector.broadcast %133 : vector<8x1xf32> to vector<8x32xf32>
    %142 = arith.subf %125, %141 : vector<8x32xf32>
    %cst_67 = arith.constant 9.99999974E-6 : f32
    %143 = vector.broadcast %cst_67 : f32 to vector<8x1xf32>
    %144 = arith.addf %140, %143 : vector<8x1xf32>
    %145 = math.rsqrt %144 : vector<8x1xf32>
    %146 = vector.broadcast %145 : vector<8x1xf32> to vector<8x32xf32>
    %147 = arith.mulf %142, %146 : vector<8x32xf32>
    %148 = vector.shape_cast %127 : vector<32xf32> to vector<1x32xf32>
    %149 = vector.broadcast %148 : vector<1x32xf32> to vector<8x32xf32>
    %150 = arith.mulf %147, %149 : vector<8x32xf32>
    %151 = vector.shape_cast %129 : vector<32xf32> to vector<1x32xf32>
    %152 = vector.broadcast %151 : vector<1x32xf32> to vector<8x32xf32>
    %153 = arith.addf %150, %152 : vector<8x32xf32>
    %154 = arith.truncf %153 : vector<8x32xf32> to vector<8x32xbf16>
    %c0_68 = arith.constant 0 : index
    %c0_69 = arith.constant 0 : index
    %155 = vector.load %arg15[%c0_68, %c0_69] : memref<32x64xbf16, #tpu.memory_space<vmem>>, vector<32x64xbf16>
    %cst_70 = arith.constant dense<0.000000e+00> : vector<8x64xf32>
    %156 = tpu.matmul %154, %155, %cst_70 {dimension_numbers = #tpu.dot_dimension_numbers<[1], [0], [0], [1], [0, 0, 1, 1], [], []>} : vector<8x32xbf16>, vector<32x64xbf16>, vector<8x64xf32> -> vector<8x64xf32>
    %c0_71 = arith.constant 0 : index
    %c0_72 = arith.constant 0 : index
    %157 = vector.load %arg16[%c0_71, %c0_72] : memref<1x64xf32, #tpu.memory_space<vmem>>, vector<1x64xf32>
    %158 = vector.shape_cast %157 : vector<1x64xf32> to vector<64xf32>
    %159 = vector.shape_cast %158 : vector<64xf32> to vector<1x64xf32>
    %160 = vector.broadcast %159 : vector<1x64xf32> to vector<8x64xf32>
    %161 = arith.addf %156, %160 : vector<8x64xf32>
    %cst_73 = arith.constant 5.000000e-01 : f32
    %162 = vector.broadcast %cst_73 : f32 to vector<8x64xf32>
    %163 = arith.mulf %162, %161 : vector<8x64xf32>
    %cst_74 = arith.constant 0.707106769 : f32
    %164 = vector.broadcast %cst_74 : f32 to vector<8x64xf32>
    %165 = arith.mulf %161, %164 : vector<8x64xf32>
    %166 = math.erf %165 : vector<8x64xf32>
    %cst_75 = arith.constant 1.000000e+00 : f32
    %167 = vector.broadcast %cst_75 : f32 to vector<8x64xf32>
    %168 = arith.addf %167, %166 : vector<8x64xf32>
    %169 = arith.mulf %163, %168 : vector<8x64xf32>
    %170 = arith.truncf %169 : vector<8x64xf32> to vector<8x64xbf16>
    %c0_76 = arith.constant 0 : index
    %c0_77 = arith.constant 0 : index
    %171 = vector.load %arg17[%c0_76, %c0_77] : memref<64x32xbf16, #tpu.memory_space<vmem>>, vector<64x32xbf16>
    %cst_78 = arith.constant dense<0.000000e+00> : vector<8x32xf32>
    %172 = tpu.matmul %170, %171, %cst_78 {dimension_numbers = #tpu.dot_dimension_numbers<[1], [0], [0], [1], [0, 0, 1, 1], [], []>} : vector<8x64xbf16>, vector<64x32xbf16>, vector<8x32xf32> -> vector<8x32xf32>
    %c0_79 = arith.constant 0 : index
    %c0_80 = arith.constant 0 : index
    %173 = vector.load %arg18[%c0_79, %c0_80] : memref<1x32xf32, #tpu.memory_space<vmem>>, vector<1x32xf32>
    %174 = vector.shape_cast %173 : vector<1x32xf32> to vector<32xf32>
    %175 = vector.shape_cast %174 : vector<32xf32> to vector<1x32xf32>
    %176 = vector.broadcast %175 : vector<1x32xf32> to vector<8x32xf32>
    %177 = arith.addf %172, %176 : vector<8x32xf32>
    %178 = arith.addf %177, %125 : vector<8x32xf32>
    %c0_81 = arith.constant 0 : index
    %c0_82 = arith.constant 0 : index
    %c0_83 = arith.constant 0 : index
    %179 = vector.load %arg19[%c0_81, %c0_82, %c0_83] : memref<1x8x32xf32, #tpu.memory_space<vmem>>, vector<1x8x32xf32>
    %180 = vector.shape_cast %179 : vector<1x8x32xf32> to vector<8x32xf32>
    %181 = vector.shape_cast %178 : vector<8x32xf32> to vector<1x8x32xf32>
    tpu.vector_store %arg19[%c0_81, %c0_82, %c0_83], %181 {strides = array<i32>} : memref<1x8x32xf32, #tpu.memory_space<vmem>>, vector<1x8x32xf32>,
    return
  }
  func.func @transform_0(%arg0: i32, %arg1: i32) -> (i32, i32, i32) {
    %c0_i32 = arith.constant 0 : i32
    %c0_i32_0 = arith.constant 0 : i32
    %c0_i32_1 = arith.constant 0 : i32
    return %arg0, %c0_i32, %c0_i32_0 : i32, i32, i32
  }
  func.func @transform_1(%arg0: i32, %arg1: i32) -> (i32, i32) {
    %c0_i32 = arith.constant 0 : i32
    %c0_i32_0 = arith.constant 0 : i32
    %c0_i32_1 = arith.constant 0 : i32
    return %c0_i32, %c0_i32_0 : i32, i32
  }
  func.func @transform_2(%arg0: i32, %arg1: i32) -> (i32, i32) {
    %c0_i32 = arith.constant 0 : i32
    %c0_i32_0 = arith.constant 0 : i32
    %c0_i32_1 = arith.constant 0 : i32
    return %c0_i32, %c0_i32_0 : i32, i32
  }
  func.func @transform_3(%arg0: i32, %arg1: i32) -> (i32, i32) {
    %c0_i32 = arith.constant 0 : i32
    %c0_i32_0 = arith.constant 0 : i32
    %c0_i32_1 = arith.constant 0 : i32
    return %c0_i32, %c0_i32_0 : i32, i32
  }
  func.func @transform_4(%arg0: i32, %arg1: i32) -> (i32, i32) {
    %c0_i32 = arith.constant 0 : i32
    %c0_i32_0 = arith.constant 0 : i32
    %c0_i32_1 = arith.constant 0 : i32
    return %c0_i32, %c0_i32_0 : i32, i32
  }
  func.func @transform_5(%arg0: i32, %arg1: i32) -> (i32, i32) {
    %c0_i32 = arith.constant 0 : i32
    %c0_i32_0 = arith.constant 0 : i32
    %c0_i32_1 = arith.constant 0 : i32
    return %c0_i32, %c0_i32_0 : i32, i32
  }
  func.func @transform_6(%arg0: i32, %arg1: i32) -> (i32, i32) {
    %c0_i32 = arith.constant 0 : i32
    %c0_i32_0 = arith.constant 0 : i32
    %c0_i32_1 = arith.constant 0 : i32
    return %c0_i32, %c0_i32_0 : i32, i32
  }
  func.func @transform_7(%arg0: i32, %arg1: i32) -> (i32, i32) {
    %c0_i32 = arith.constant 0 : i32
    %c0_i32_0 = arith.constant 0 : i32
    %c0_i32_1 = arith.constant 0 : i32
    return %c0_i32, %c0_i32_0 : i32, i32
  }
  func.func @transform_8(%arg0: i32, %arg1: i32) -> (i32, i32) {
    %c0_i32 = arith.constant 0 : i32
    %c0_i32_0 = arith.constant 0 : i32
    %c0_i32_1 = arith.constant 0 : i32
    return %c0_i32, %c0_i32_0 : i32, i32
  }
  func.func @transform_9(%arg0: i32, %arg1: i32) -> (i32, i32) {
    %c0_i32 = arith.constant 0 : i32
    %c0_i32_0 = arith.constant 0 : i32
    %c0_i32_1 = arith.constant 0 : i32
    return %c0_i32, %c0_i32_0 : i32, i32
  }
  func.func @transform_10(%arg0: i32, %arg1: i32) -> (i32, i32) {
    %c0_i32 = arith.constant 0 : i32
    %c0_i32_0 = arith.constant 0 : i32
    %c0_i32_1 = arith.constant 0 : i32
    return %c0_i32, %c0_i32_0 : i32, i32
  }
  func.func @transform_11(%arg0: i32, %arg1: i32) -> (i32, i32) {
    %c0_i32 = arith.constant 0 : i32
    %c0_i32_0 = arith.constant 0 : i32
    %c0_i32_1 = arith.constant 0 : i32
    return %c0_i32, %c0_i32_0 : i32, i32
  }
  func.func @transform_12(%arg0: i32, %arg1: i32) -> (i32, i32) {
    %c0_i32 = arith.constant 0 : i32
    %c0_i32_0 = arith.constant 0 : i32
    %c0_i32_1 = arith.constant 0 : i32
    return %c0_i32, %c0_i32_0 : i32, i32
  }
  func.func @transform_13(%arg0: i32, %arg1: i32) -> (i32, i32) {
    %c0_i32 = arith.constant 0 : i32
    %c0_i32_0 = arith.constant 0 : i32
    %c0_i32_1 = arith.constant 0 : i32
    return %c0_i32, %c0_i32_0 : i32, i32
  }
  func.func @transform_14(%arg0: i32, %arg1: i32) -> (i32, i32) {
    %c0_i32 = arith.constant 0 : i32
    %c0_i32_0 = arith.constant 0 : i32
    %c0_i32_1 = arith.constant 0 : i32
    return %c0_i32, %c0_i32_0 : i32, i32
  }
  func.func @transform_15(%arg0: i32, %arg1: i32) -> (i32, i32) {
    %c0_i32 = arith.constant 0 : i32
    %c0_i32_0 = arith.constant 0 : i32
    %c0_i32_1 = arith.constant 0 : i32
    return %c0_i32, %c0_i32_0 : i32, i32
  }
  func.func @transform_16(%arg0: i32, %arg1: i32) -> (i32, i32) {
    %c0_i32 = arith.constant 0 : i32
    %c0_i32_0 = arith.constant 0 : i32
    %c0_i32_1 = arith.constant 0 : i32
    return %c0_i32, %c0_i32_0 : i32, i32
  }
  func.func @transform_17(%arg0: i32, %arg1: i32) -> (i32, i32, i32) {
    %c0_i32 = arith.constant 0 : i32
    %c0_i32_0 = arith.constant 0 : i32
    return %arg0, %arg1, %c0_i32 : i32, i32, i32
  }
}

module attributes {stable_mosaic.version = 11 : i64} {
  func.func @_block_kernel(%arg0: i32, %arg1: i32, %arg2: memref<1x8x32xf32, #tpu.memory_space<vmem>>, %arg3: memref<1x32xf32, #tpu.memory_space<vmem>>, %arg4: memref<1x32xf32, #tpu.memory_space<vmem>>, %arg5: memref<32x32xbf16, #tpu.memory_space<vmem>>, %arg6: memref<1x32xf32, #tpu.memory_space<vmem>>, %arg7: memref<32x32xbf16, #tpu.memory_space<vmem>>, %arg8: memref<1x32xf32, #tpu.memory_space<vmem>>, %arg9: memref<32x32xbf16, #tpu.memory_space<vmem>>, %arg10: memref<1x32xf32, #tpu.memory_space<vmem>>, %arg11: memref<32x32xbf16, #tpu.memory_space<vmem>>, %arg12: memref<1x32xf32, #tpu.memory_space<vmem>>, %arg13: memref<1x32xf32, #tpu.memory_space<vmem>>, %arg14: memref<1x32xf32, #tpu.memory_space<vmem>>, %arg15: memref<32x64xbf16, #tpu.memory_space<vmem>>, %arg16: memref<1x64xf32, #tpu.memory_space<vmem>>, %arg17: memref<64x32xbf16, #tpu.memory_space<vmem>>, %arg18: memref<1x32xf32, #tpu.memory_space<vmem>>, %arg19: memref<1x8x32xf32, #tpu.memory_space<vmem>>, %arg20: memref<8x32xbf16, #tpu.memory_space<vmem>>, %arg21: memref<8x32xbf16, #tpu.memory_space<vmem>>, %arg22: memref<8x32xbf16, #tpu.memory_space<vmem>>) attributes {dimension_semantics = [#tpu.dimension_semantics<parallel>, #tpu.dimension_semantics<arbitrary>], iteration_bounds = array<i64: 2, 1>, scalar_prefetch = 0 : i64, scratch_operands = 3 : i64, tpu.core_type = #tpu.core_type<tc>, window_params = [{transform_indices = @transform_0, window_bounds = array<i64: 1, 8, 32>}, {pipeline_mode = #tpu.pipeline_mode<synchronous>, transform_indices = @transform_1, window_bounds = array<i64: 1, 32>}, {pipeline_mode = #tpu.pipeline_mode<synchronous>, transform_indices = @transform_2, window_bounds = array<i64: 1, 32>}, {pipeline_mode = #tpu.pipeline_mode<synchronous>, transform_indices = @transform_3, window_bounds = array<i64: 32, 32>}, {pipeline_mode = #tpu.pipeline_mode<synchronous>, transform_indices = @transform_4, window_bounds = array<i64: 1, 32>}, {pipeline_mode = #tpu.pipeline_mode<synchronous>, transform_indices = @transform_5, window_bounds = array<i64: 32, 32>}, {pipeline_mode = #tpu.pipeline_mode<synchronous>, transform_indices = @transform_6, window_bounds = array<i64: 1, 32>}, {pipeline_mode = #tpu.pipeline_mode<synchronous>, transform_indices = @transform_7, window_bounds = array<i64: 32, 32>}, {pipeline_mode = #tpu.pipeline_mode<synchronous>, transform_indices = @transform_8, window_bounds = array<i64: 1, 32>}, {pipeline_mode = #tpu.pipeline_mode<synchronous>, transform_indices = @transform_9, window_bounds = array<i64: 32, 32>}, {pipeline_mode = #tpu.pipeline_mode<synchronous>, transform_indices = @transform_10, window_bounds = array<i64: 1, 32>}, {pipeline_mode = #tpu.pipeline_mode<synchronous>, transform_indices = @transform_11, window_bounds = array<i64: 1, 32>}, {pipeline_mode = #tpu.pipeline_mode<synchronous>, transform_indices = @transform_12, window_bounds = array<i64: 1, 32>}, {pipeline_mode = #tpu.pipeline_mode<synchronous>, transform_indices = @transform_13, window_bounds = array<i64: 32, 64>}, {pipeline_mode = #tpu.pipeline_mode<synchronous>, transform_indices = @transform_14, window_bounds = array<i64: 1, 64>}, {pipeline_mode = #tpu.pipeline_mode<synchronous>, transform_indices = @transform_15, window_bounds = array<i64: 64, 32>}, {pipeline_mode = #tpu.pipeline_mode<synchronous>, transform_indices = @transform_16, window_bounds = array<i64: 1, 32>}, {transform_indices = @transform_17, window_bounds = array<i64: 1, 8, 32>}]} {
    %c0_i32 = arith.constant 0 : i32
    %0 = arith.cmpi eq, %arg1, %c0_i32 : i32
    %1 = arith.extui %0 : i1 to i32
    %c0_i32_0 = arith.constant 0 : i32
    %2 = arith.cmpi ne, %1, %c0_i32_0 : i32
    scf.if %2 {
      %c0_i32_84 = arith.constant 0 : i32
      %c8_i32_85 = arith.constant 8 : i32
      %182 = arith.muli %c0_i32_84, %c8_i32_85 : i32
      %183 = tpu.assume_multiple %182, 8 : i32
      %c0_86 = arith.constant 0 : index
      %184 = arith.index_cast %183 : i32 to index
      %c0_87 = arith.constant 0 : index
      %185 = vector.load %arg2[%c0_86, %184, %c0_87] : memref<1x8x32xf32, #tpu.memory_space<vmem>>, vector<1x8x32xf32>
      %186 = vector.shape_cast %185 : vector<1x8x32xf32> to vector<8x32xf32>
      %c0_88 = arith.constant 0 : index
      %c0_89 = arith.constant 0 : index
      %187 = vector.load %arg3[%c0_88, %c0_89] : memref<1x32xf32, #tpu.memory_space<vmem>>, vector<1x32xf32>
      %188 = vector.shape_cast %187 : vector<1x32xf32> to vector<32xf32>
      %c0_90 = arith.constant 0 : index
      %c0_91 = arith.constant 0 : index
      %189 = vector.load %arg4[%c0_90, %c0_91] : memref<1x32xf32, #tpu.memory_space<vmem>>, vector<1x32xf32>
      %190 = vector.shape_cast %189 : vector<1x32xf32> to vector<32xf32>
      %cst_92 = arith.constant dense<0.000000e+00> : vector<8xf32>
      %191 = vector.multi_reduction <add>, %186, %cst_92 [1] : vector<8x32xf32> to vector<8xf32>
      %192 = vector.shape_cast %191 : vector<8xf32> to vector<8x1xf32>
      %cst_93 = arith.constant 3.200000e+01 : f32
      %193 = vector.broadcast %cst_93 : f32 to vector<8x1xf32>
      %194 = arith.divf %192, %193 : vector<8x1xf32>
      %195 = vector.broadcast %194 : vector<8x1xf32> to vector<8x32xf32>
      %196 = arith.subf %186, %195 : vector<8x32xf32>
      %197 = arith.mulf %196, %196 : vector<8x32xf32>
      %cst_94 = arith.constant dense<0.000000e+00> : vector<8xf32>
      %198 = vector.multi_reduction <add>, %197, %cst_94 [1] : vector<8x32xf32> to vector<8xf32>
      %199 = vector.shape_cast %198 : vector<8xf32> to vector<8x1xf32>
      %cst_95 = arith.constant 3.200000e+01 : f32
      %200 = vector.broadcast %cst_95 : f32 to vector<8x1xf32>
      %201 = arith.divf %199, %200 : vector<8x1xf32>
      %202 = vector.broadcast %194 : vector<8x1xf32> to vector<8x32xf32>
      %203 = arith.subf %186, %202 : vector<8x32xf32>
      %cst_96 = arith.constant 9.99999974E-6 : f32
      %204 = vector.broadcast %cst_96 : f32 to vector<8x1xf32>
      %205 = arith.addf %201, %204 : vector<8x1xf32>
      %206 = math.rsqrt %205 : vector<8x1xf32>
      %207 = vector.broadcast %206 : vector<8x1xf32> to vector<8x32xf32>
      %208 = arith.mulf %203, %207 : vector<8x32xf32>
      %209 = vector.shape_cast %188 : vector<32xf32> to vector<1x32xf32>
      %210 = vector.broadcast %209 : vector<1x32xf32> to vector<8x32xf32>
      %211 = arith.mulf %208, %210 : vector<8x32xf32>
      %212 = vector.shape_cast %190 : vector<32xf32> to vector<1x32xf32>
      %213 = vector.broadcast %212 : vector<1x32xf32> to vector<8x32xf32>
      %214 = arith.addf %211, %213 : vector<8x32xf32>
      %215 = arith.truncf %214 : vector<8x32xf32> to vector<8x32xbf16>
      %c0_97 = arith.constant 0 : index
      %c0_98 = arith.constant 0 : index
      %216 = vector.load %arg7[%c0_97, %c0_98] : memref<32x32xbf16, #tpu.memory_space<vmem>>, vector<32x32xbf16>
      %cst_99 = arith.constant dense<0.000000e+00> : vector<8x32xf32>
      %217 = tpu.matmul %215, %216, %cst_99 {dimension_numbers = #tpu.dot_dimension_numbers<[1], [0], [0], [1], [0, 0, 1, 1], [], []>} : vector<8x32xbf16>, vector<32x32xbf16>, vector<8x32xf32> -> vector<8x32xf32>
      %c0_100 = arith.constant 0 : index
      %c0_101 = arith.constant 0 : index
      %218 = vector.load %arg8[%c0_100, %c0_101] : memref<1x32xf32, #tpu.memory_space<vmem>>, vector<1x32xf32>
      %219 = vector.shape_cast %218 : vector<1x32xf32> to vector<32xf32>
      %220 = vector.shape_cast %219 : vector<32xf32> to vector<1x32xf32>
      %221 = vector.broadcast %220 : vector<1x32xf32> to vector<8x32xf32>
      %222 = arith.addf %217, %221 : vector<8x32xf32>
      %c0_102 = arith.constant 0 : index
      %c0_103 = arith.constant 0 : index
      %223 = vector.load %arg9[%c0_102, %c0_103] : memref<32x32xbf16, #tpu.memory_space<vmem>>, vector<32x32xbf16>
      %cst_104 = arith.constant dense<0.000000e+00> : vector<8x32xf32>
      %224 = tpu.matmul %215, %223, %cst_104 {dimension_numbers = #tpu.dot_dimension_numbers<[1], [0], [0], [1], [0, 0, 1, 1], [], []>} : vector<8x32xbf16>, vector<32x32xbf16>, vector<8x32xf32> -> vector<8x32xf32>
      %c0_105 = arith.constant 0 : index
      %c0_106 = arith.constant 0 : index
      %225 = vector.load %arg10[%c0_105, %c0_106] : memref<1x32xf32, #tpu.memory_space<vmem>>, vector<1x32xf32>
      %226 = vector.shape_cast %225 : vector<1x32xf32> to vector<32xf32>
      %227 = vector.shape_cast %226 : vector<32xf32> to vector<1x32xf32>
      %228 = vector.broadcast %227 : vector<1x32xf32> to vector<8x32xf32>
      %229 = arith.addf %224, %228 : vector<8x32xf32>
      %230 = arith.truncf %222 : vector<8x32xf32> to vector<8x32xbf16>
      %231 = arith.index_cast %183 : i32 to index
      %c0_107 = arith.constant 0 : index
      %232 = vector.load %arg20[%231, %c0_107] : memref<8x32xbf16, #tpu.memory_space<vmem>>, vector<8x32xbf16>
      tpu.vector_store %arg20[%231, %c0_107], %230 {strides = array<i32>} : memref<8x32xbf16, #tpu.memory_space<vmem>>, vector<8x32xbf16>,
      %233 = arith.truncf %229 : vector<8x32xf32> to vector<8x32xbf16>
      %234 = arith.index_cast %183 : i32 to index
      %c0_108 = arith.constant 0 : index
      %235 = vector.load %arg21[%234, %c0_108] : memref<8x32xbf16, #tpu.memory_space<vmem>>, vector<8x32xbf16>
      tpu.vector_store %arg21[%234, %c0_108], %233 {strides = array<i32>} : memref<8x32xbf16, #tpu.memory_space<vmem>>, vector<8x32xbf16>,
      %c1_i32 = arith.constant 1 : i32
    } else {
    }
    %c8_i32 = arith.constant 8 : i32
    %3 = arith.muli %arg1, %c8_i32 : i32
    %4 = tpu.assume_multiple %3, 8 : i32
    %c0 = arith.constant 0 : index
    %5 = arith.index_cast %4 : i32 to index
    %c0_1 = arith.constant 0 : index
    %6 = vector.load %arg2[%c0, %5, %c0_1] : memref<1x8x32xf32, #tpu.memory_space<vmem>>, vector<1x8x32xf32>
    %7 = vector.shape_cast %6 : vector<1x8x32xf32> to vector<8x32xf32>
    %c0_2 = arith.constant 0 : index
    %c0_3 = arith.constant 0 : index
    %8 = vector.load %arg3[%c0_2, %c0_3] : memref<1x32xf32, #tpu.memory_space<vmem>>, vector<1x32xf32>
    %9 = vector.shape_cast %8 : vector<1x32xf32> to vector<32xf32>
    %c0_4 = arith.constant 0 : index
    %c0_5 = arith.constant 0 : index
    %10 = vector.load %arg4[%c0_4, %c0_5] : memref<1x32xf32, #tpu.memory_space<vmem>>, vector<1x32xf32>
    %11 = vector.shape_cast %10 : vector<1x32xf32> to vector<32xf32>
    %cst = arith.constant dense<0.000000e+00> : vector<8xf32>
    %12 = vector.multi_reduction <add>, %7, %cst [1] : vector<8x32xf32> to vector<8xf32>
    %13 = vector.shape_cast %12 : vector<8xf32> to vector<8x1xf32>
    %cst_6 = arith.constant 3.200000e+01 : f32
    %14 = vector.broadcast %cst_6 : f32 to vector<8x1xf32>
    %15 = arith.divf %13, %14 : vector<8x1xf32>
    %16 = vector.broadcast %15 : vector<8x1xf32> to vector<8x32xf32>
    %17 = arith.subf %7, %16 : vector<8x32xf32>
    %18 = arith.mulf %17, %17 : vector<8x32xf32>
    %cst_7 = arith.constant dense<0.000000e+00> : vector<8xf32>
    %19 = vector.multi_reduction <add>, %18, %cst_7 [1] : vector<8x32xf32> to vector<8xf32>
    %20 = vector.shape_cast %19 : vector<8xf32> to vector<8x1xf32>
    %cst_8 = arith.constant 3.200000e+01 : f32
    %21 = vector.broadcast %cst_8 : f32 to vector<8x1xf32>
    %22 = arith.divf %20, %21 : vector<8x1xf32>
    %23 = vector.broadcast %15 : vector<8x1xf32> to vector<8x32xf32>
    %24 = arith.subf %7, %23 : vector<8x32xf32>
    %cst_9 = arith.constant 9.99999974E-6 : f32
    %25 = vector.broadcast %cst_9 : f32 to vector<8x1xf32>
    %26 = arith.addf %22, %25 : vector<8x1xf32>
    %27 = math.rsqrt %26 : vector<8x1xf32>
    %28 = vector.broadcast %27 : vector<8x1xf32> to vector<8x32xf32>
    %29 = arith.mulf %24, %28 : vector<8x32xf32>
    %30 = vector.shape_cast %9 : vector<32xf32> to vector<1x32xf32>
    %31 = vector.broadcast %30 : vector<1x32xf32> to vector<8x32xf32>
    %32 = arith.mulf %29, %31 : vector<8x32xf32>
    %33 = vector.shape_cast %11 : vector<32xf32> to vector<1x32xf32>
    %34 = vector.broadcast %33 : vector<1x32xf32> to vector<8x32xf32>
    %35 = arith.addf %32, %34 : vector<8x32xf32>
    %36 = arith.truncf %35 : vector<8x32xf32> to vector<8x32xbf16>
    %c0_10 = arith.constant 0 : index
    %c0_11 = arith.constant 0 : index
    %37 = vector.load %arg5[%c0_10, %c0_11] : memref<32x32xbf16, #tpu.memory_space<vmem>>, vector<32x32xbf16>
    %cst_12 = arith.constant dense<0.000000e+00> : vector<8x32xf32>
    %38 = tpu.matmul %36, %37, %cst_12 {dimension_numbers = #tpu.dot_dimension_numbers<[1], [0], [0], [1], [0, 0, 1, 1], [], []>} : vector<8x32xbf16>, vector<32x32xbf16>, vector<8x32xf32> -> vector<8x32xf32>
    %c0_13 = arith.constant 0 : index
    %c0_14 = arith.constant 0 : index
    %39 = vector.load %arg6[%c0_13, %c0_14] : memref<1x32xf32, #tpu.memory_space<vmem>>, vector<1x32xf32>
    %40 = vector.shape_cast %39 : vector<1x32xf32> to vector<32xf32>
    %41 = vector.shape_cast %40 : vector<32xf32> to vector<1x32xf32>
    %42 = vector.broadcast %41 : vector<1x32xf32> to vector<8x32xf32>
    %43 = arith.addf %38, %42 : vector<8x32xf32>
    %44 = arith.truncf %43 : vector<8x32xf32> to vector<8x32xbf16>
    %45 = vector.extract_strided_slice %44 {offsets = [0, 0], sizes = [8, 8], strides = [1, 1]} : vector<8x32xbf16> to vector<8x8xbf16>
    %c0_15 = arith.constant 0 : index
    %c0_16 = arith.constant 0 : index
    %46 = vector.load %arg20[%c0_15, %c0_16] : memref<8x32xbf16, #tpu.memory_space<vmem>>, vector<8x8xbf16>
    %c0_17 = arith.constant 0 : index
    %c0_18 = arith.constant 0 : index
    %47 = vector.load %arg21[%c0_17, %c0_18] : memref<8x32xbf16, #tpu.memory_space<vmem>>, vector<8x8xbf16>
    %cst_19 = arith.constant dense<0.000000e+00> : vector<8x8xf32>
    %48 = tpu.matmul %45, %46, %cst_19 {dimension_numbers = #tpu.dot_dimension_numbers<[1], [1], [0], [0], [0, 0, 1, 0], [], []>} : vector<8x8xbf16>, vector<8x8xbf16>, vector<8x8xf32> -> vector<8x8xf32>
    %cst_20 = arith.constant dense<0xFF800000> : vector<8xf32>
    %49 = vector.multi_reduction <maximumf>, %48, %cst_20 [1] : vector<8x8xf32> to vector<8xf32>
    %50 = vector.shape_cast %49 : vector<8xf32> to vector<8x1xf32>
    %51 = vector.broadcast %50 : vector<8x1xf32> to vector<8x8xf32>
    %52 = arith.subf %48, %51 : vector<8x8xf32>
    %53 = math.exp %52 : vector<8x8xf32>
    %cst_21 = arith.constant dense<0.000000e+00> : vector<8xf32>
    %54 = vector.multi_reduction <add>, %53, %cst_21 [1] : vector<8x8xf32> to vector<8xf32>
    %55 = vector.shape_cast %54 : vector<8xf32> to vector<8x1xf32>
    %56 = tpu.reciprocal %55 {approx = true} : vector<8x1xf32> -> vector<8x1xf32>
    %57 = vector.broadcast %56 : vector<8x1xf32> to vector<8x8xf32>
    %58 = arith.mulf %53, %57 : vector<8x8xf32>
    %59 = arith.truncf %58 : vector<8x8xf32> to vector<8x8xbf16>
    %cst_22 = arith.constant dense<0.000000e+00> : vector<8x8xf32>
    %60 = tpu.matmul %59, %47, %cst_22 {dimension_numbers = #tpu.dot_dimension_numbers<[1], [0], [0], [1], [0, 0, 1, 1], [], []>} : vector<8x8xbf16>, vector<8x8xbf16>, vector<8x8xf32> -> vector<8x8xf32>
    %61 = arith.truncf %60 : vector<8x8xf32> to vector<8x8xbf16>
    %c0_23 = arith.constant 0 : index
    %c0_24 = arith.constant 0 : index
    %62 = vector.load %arg22[%c0_23, %c0_24] : memref<8x32xbf16, #tpu.memory_space<vmem>>, vector<8x8xbf16>
    tpu.vector_store %arg22[%c0_23, %c0_24], %61 {strides = array<i32>} : memref<8x32xbf16, #tpu.memory_space<vmem>>, vector<8x8xbf16>,
    %63 = vector.extract_strided_slice %44 {offsets = [0, 8], sizes = [8, 8], strides = [1, 1]} : vector<8x32xbf16> to vector<8x8xbf16>
    %c0_25 = arith.constant 0 : index
    %c8 = arith.constant 8 : index
    %64 = vector.load %arg20[%c0_25, %c8] : memref<8x32xbf16, #tpu.memory_space<vmem>>, vector<8x8xbf16>
    %c0_26 = arith.constant 0 : index
    %c8_27 = arith.constant 8 : index
    %65 = vector.load %arg21[%c0_26, %c8_27] : memref<8x32xbf16, #tpu.memory_space<vmem>>, vector<8x8xbf16>
    %cst_28 = arith.constant dense<0.000000e+00> : vector<8x8xf32>
    %66 = tpu.matmul %63, %64, %cst_28 {dimension_numbers = #tpu.dot_dimension_numbers<[1], [1], [0], [0], [0, 0, 1, 0], [], []>} : vector<8x8xbf16>, vector<8x8xbf16>, vector<8x8xf32> -> vector<8x8xf32>
    %cst_29 = arith.constant dense<0xFF800000> : vector<8xf32>
    %67 = vector.multi_reduction <maximumf>, %66, %cst_29 [1] : vector<8x8xf32> to vector<8xf32>
    %68 = vector.shape_cast %67 : vector<8xf32> to vector<8x1xf32>
    %69 = vector.broadcast %68 : vector<8x1xf32> to vector<8x8xf32>
    %70 = arith.subf %66, %69 : vector<8x8xf32>
    %71 = math.exp %70 : vector<8x8xf32>
    %cst_30 = arith.constant dense<0.000000e+00> : vector<8xf32>
    %72 = vector.multi_reduction <add>, %71, %cst_30 [1] : vector<8x8xf32> to vector<8xf32>
    %73 = vector.shape_cast %72 : vector<8xf32> to vector<8x1xf32>
    %74 = tpu.reciprocal %73 {approx = true} : vector<8x1xf32> -> vector<8x1xf32>
    %75 = vector.broadcast %74 : vector<8x1xf32> to vector<8x8xf32>
    %76 = arith.mulf %71, %75 : vector<8x8xf32>
    %77 = arith.truncf %76 : vector<8x8xf32> to vector<8x8xbf16>
    %cst_31 = arith.constant dense<0.000000e+00> : vector<8x8xf32>
    %78 = tpu.matmul %77, %65, %cst_31 {dimension_numbers = #tpu.dot_dimension_numbers<[1], [0], [0], [1], [0, 0, 1, 1], [], []>} : vector<8x8xbf16>, vector<8x8xbf16>, vector<8x8xf32> -> vector<8x8xf32>
    %79 = arith.truncf %78 : vector<8x8xf32> to vector<8x8xbf16>
    %c0_32 = arith.constant 0 : index
    %c8_33 = arith.constant 8 : index
    %80 = vector.load %arg22[%c0_32, %c8_33] : memref<8x32xbf16, #tpu.memory_space<vmem>>, vector<8x8xbf16>
    tpu.vector_store %arg22[%c0_32, %c8_33], %79 {strides = array<i32>} : memref<8x32xbf16, #tpu.memory_space<vmem>>, vector<8x8xbf16>,
    %81 = vector.extract_strided_slice %44 {offsets = [0, 16], sizes = [8, 8], strides = [1, 1]} : vector<8x32xbf16> to vector<8x8xbf16>
    %c0_34 = arith.constant 0 : index
    %c16 = arith.constant 16 : index
    %82 = vector.load %arg20[%c0_34, %c16] : memref<8x32xbf16, #tpu.memory_space<vmem>>, vector<8x8xbf16>
    %c0_35 = arith.constant 0 : index
    %c16_36 = arith.constant 16 : index
    %83 = vector.load %arg21[%c0_35, %c16_36] : memref<8x32xbf16, #tpu.memory_space<vmem>>, vector<8x8xbf16>
    %cst_37 = arith.constant dense<0.000000e+00> : vector<8x8xf32>
    %84 = tpu.matmul %81, %82, %cst_37 {dimension_numbers = #tpu.dot_dimension_numbers<[1], [1], [0], [0], [0, 0, 1, 0], [], []>} : vector<8x8xbf16>, vector<8x8xbf16>, vector<8x8xf32> -> vector<8x8xf32>
    %cst_38 = arith.constant dense<0xFF800000> : vector<8xf32>
    %85 = vector.multi_reduction <maximumf>, %84, %cst_38 [1] : vector<8x8xf32> to vector<8xf32>
    %86 = vector.shape_cast %85 : vector<8xf32> to vector<8x1xf32>
    %87 = vector.broadcast %86 : vector<8x1xf32> to vector<8x8xf32>
    %88 = arith.subf %84, %87 : vector<8x8xf32>
    %89 = math.exp %88 : vector<8x8xf32>
    %cst_39 = arith.constant dense<0.000000e+00> : vector<8xf32>
    %90 = vector.multi_reduction <add>, %89, %cst_39 [1] : vector<8x8xf32> to vector<8xf32>
    %91 = vector.shape_cast %90 : vector<8xf32> to vector<8x1xf32>
    %92 = tpu.reciprocal %91 {approx = true} : vector<8x1xf32> -> vector<8x1xf32>
    %93 = vector.broadcast %92 : vector<8x1xf32> to vector<8x8xf32>
    %94 = arith.mulf %89, %93 : vector<8x8xf32>
    %95 = arith.truncf %94 : vector<8x8xf32> to vector<8x8xbf16>
    %cst_40 = arith.constant dense<0.000000e+00> : vector<8x8xf32>
    %96 = tpu.matmul %95, %83, %cst_40 {dimension_numbers = #tpu.dot_dimension_numbers<[1], [0], [0], [1], [0, 0, 1, 1], [], []>} : vector<8x8xbf16>, vector<8x8xbf16>, vector<8x8xf32> -> vector<8x8xf32>
    %97 = arith.truncf %96 : vector<8x8xf32> to vector<8x8xbf16>
    %c0_41 = arith.constant 0 : index
    %c16_42 = arith.constant 16 : index
    %98 = vector.load %arg22[%c0_41, %c16_42] : memref<8x32xbf16, #tpu.memory_space<vmem>>, vector<8x8xbf16>
    tpu.vector_store %arg22[%c0_41, %c16_42], %97 {strides = array<i32>} : memref<8x32xbf16, #tpu.memory_space<vmem>>, vector<8x8xbf16>,
    %99 = vector.extract_strided_slice %44 {offsets = [0, 24], sizes = [8, 8], strides = [1, 1]} : vector<8x32xbf16> to vector<8x8xbf16>
    %c0_43 = arith.constant 0 : index
    %c24 = arith.constant 24 : index
    %100 = vector.load %arg20[%c0_43, %c24] : memref<8x32xbf16, #tpu.memory_space<vmem>>, vector<8x8xbf16>
    %c0_44 = arith.constant 0 : index
    %c24_45 = arith.constant 24 : index
    %101 = vector.load %arg21[%c0_44, %c24_45] : memref<8x32xbf16, #tpu.memory_space<vmem>>, vector<8x8xbf16>
    %cst_46 = arith.constant dense<0.000000e+00> : vector<8x8xf32>
    %102 = tpu.matmul %99, %100, %cst_46 {dimension_numbers = #tpu.dot_dimension_numbers<[1], [1], [0], [0], [0, 0, 1, 0], [], []>} : vector<8x8xbf16>, vector<8x8xbf16>, vector<8x8xf32> -> vector<8x8xf32>
    %cst_47 = arith.constant dense<0xFF800000> : vector<8xf32>
    %103 = vector.multi_reduction <maximumf>, %102, %cst_47 [1] : vector<8x8xf32> to vector<8xf32>
    %104 = vector.shape_cast %103 : vector<8xf32> to vector<8x1xf32>
    %105 = vector.broadcast %104 : vector<8x1xf32> to vector<8x8xf32>
    %106 = arith.subf %102, %105 : vector<8x8xf32>
    %107 = math.exp %106 : vector<8x8xf32>
    %cst_48 = arith.constant dense<0.000000e+00> : vector<8xf32>
    %108 = vector.multi_reduction <add>, %107, %cst_48 [1] : vector<8x8xf32> to vector<8xf32>
    %109 = vector.shape_cast %108 : vector<8xf32> to vector<8x1xf32>
    %110 = tpu.reciprocal %109 {approx = true} : vector<8x1xf32> -> vector<8x1xf32>
    %111 = vector.broadcast %110 : vector<8x1xf32> to vector<8x8xf32>
    %112 = arith.mulf %107, %111 : vector<8x8xf32>
    %113 = arith.truncf %112 : vector<8x8xf32> to vector<8x8xbf16>
    %cst_49 = arith.constant dense<0.000000e+00> : vector<8x8xf32>
    %114 = tpu.matmul %113, %101, %cst_49 {dimension_numbers = #tpu.dot_dimension_numbers<[1], [0], [0], [1], [0, 0, 1, 1], [], []>} : vector<8x8xbf16>, vector<8x8xbf16>, vector<8x8xf32> -> vector<8x8xf32>
    %115 = arith.truncf %114 : vector<8x8xf32> to vector<8x8xbf16>
    %c0_50 = arith.constant 0 : index
    %c24_51 = arith.constant 24 : index
    %116 = vector.load %arg22[%c0_50, %c24_51] : memref<8x32xbf16, #tpu.memory_space<vmem>>, vector<8x8xbf16>
    tpu.vector_store %arg22[%c0_50, %c24_51], %115 {strides = array<i32>} : memref<8x32xbf16, #tpu.memory_space<vmem>>, vector<8x8xbf16>,
    %c0_52 = arith.constant 0 : index
    %c0_53 = arith.constant 0 : index
    %117 = vector.load %arg22[%c0_52, %c0_53] : memref<8x32xbf16, #tpu.memory_space<vmem>>, vector<8x32xbf16>
    %c0_54 = arith.constant 0 : index
    %c0_55 = arith.constant 0 : index
    %118 = vector.load %arg11[%c0_54, %c0_55] : memref<32x32xbf16, #tpu.memory_space<vmem>>, vector<32x32xbf16>
    %cst_56 = arith.constant dense<0.000000e+00> : vector<8x32xf32>
    %119 = tpu.matmul %117, %118, %cst_56 {dimension_numbers = #tpu.dot_dimension_numbers<[1], [0], [0], [1], [0, 0, 1, 1], [], []>} : vector<8x32xbf16>, vector<32x32xbf16>, vector<8x32xf32> -> vector<8x32xf32>
    %c0_57 = arith.constant 0 : index
    %c0_58 = arith.constant 0 : index
    %120 = vector.load %arg12[%c0_57, %c0_58] : memref<1x32xf32, #tpu.memory_space<vmem>>, vector<1x32xf32>
    %121 = vector.shape_cast %120 : vector<1x32xf32> to vector<32xf32>
    %122 = vector.shape_cast %121 : vector<32xf32> to vector<1x32xf32>
    %123 = vector.broadcast %122 : vector<1x32xf32> to vector<8x32xf32>
    %124 = arith.addf %119, %123 : vector<8x32xf32>
    %125 = arith.addf %7, %124 : vector<8x32xf32>
    %c0_59 = arith.constant 0 : index
    %c0_60 = arith.constant 0 : index
    %126 = vector.load %arg13[%c0_59, %c0_60] : memref<1x32xf32, #tpu.memory_space<vmem>>, vector<1x32xf32>
    %127 = vector.shape_cast %126 : vector<1x32xf32> to vector<32xf32>
    %c0_61 = arith.constant 0 : index
    %c0_62 = arith.constant 0 : index
    %128 = vector.load %arg14[%c0_61, %c0_62] : memref<1x32xf32, #tpu.memory_space<vmem>>, vector<1x32xf32>
    %129 = vector.shape_cast %128 : vector<1x32xf32> to vector<32xf32>
    %cst_63 = arith.constant dense<0.000000e+00> : vector<8xf32>
    %130 = vector.multi_reduction <add>, %125, %cst_63 [1] : vector<8x32xf32> to vector<8xf32>
    %131 = vector.shape_cast %130 : vector<8xf32> to vector<8x1xf32>
    %cst_64 = arith.constant 3.200000e+01 : f32
    %132 = vector.broadcast %cst_64 : f32 to vector<8x1xf32>
    %133 = arith.divf %131, %132 : vector<8x1xf32>
    %134 = vector.broadcast %133 : vector<8x1xf32> to vector<8x32xf32>
    %135 = arith.subf %125, %134 : vector<8x32xf32>
    %136 = arith.mulf %135, %135 : vector<8x32xf32>
    %cst_65 = arith.constant dense<0.000000e+00> : vector<8xf32>
    %137 = vector.multi_reduction <add>, %136, %cst_65 [1] : vector<8x32xf32> to vector<8xf32>
    %138 = vector.shape_cast %137 : vector<8xf32> to vector<8x1xf32>
    %cst_66 = arith.constant 3.200000e+01 : f32
    %139 = vector.broadcast %cst_66 : f32 to vector<8x1xf32>
    %140 = arith.divf %138, %139 : vector<8x1xf32>
    %141 = vector.broadcast %133 : vector<8x1xf32> to vector<8x32xf32>
    %142 = arith.subf %125, %141 : vector<8x32xf32>
    %cst_67 = arith.constant 9.99999974E-6 : f32
    %143 = vector.broadcast %cst_67 : f32 to vector<8x1xf32>
    %144 = arith.addf %140, %143 : vector<8x1xf32>
    %145 = math.rsqrt %144 : vector<8x1xf32>
    %146 = vector.broadcast %145 : vector<8x1xf32> to vector<8x32xf32>
    %147 = arith.mulf %142, %146 : vector<8x32xf32>
    %148 = vector.shape_cast %127 : vector<32xf32> to vector<1x32xf32>
    %149 = vector.broadcast %148 : vector<1x32xf32> to vector<8x32xf32>
    %150 = arith.mulf %147, %149 : vector<8x32xf32>
    %151 = vector.shape_cast %129 : vector<32xf32> to vector<1x32xf32>
    %152 = vector.broadcast %151 : vector<1x32xf32> to vector<8x32xf32>
    %153 = arith.addf %150, %152 : vector<8x32xf32>
    %154 = arith.truncf %153 : vector<8x32xf32> to vector<8x32xbf16>
    %c0_68 = arith.constant 0 : index
    %c0_69 = arith.constant 0 : index
    %155 = vector.load %arg15[%c0_68, %c0_69] : memref<32x64xbf16, #tpu.memory_space<vmem>>, vector<32x64xbf16>
    %cst_70 = arith.constant dense<0.000000e+00> : vector<8x64xf32>
    %156 = tpu.matmul %154, %155, %cst_70 {dimension_numbers = #tpu.dot_dimension_numbers<[1], [0], [0], [1], [0, 0, 1, 1], [], []>} : vector<8x32xbf16>, vector<32x64xbf16>, vector<8x64xf32> -> vector<8x64xf32>
    %c0_71 = arith.constant 0 : index
    %c0_72 = arith.constant 0 : index
    %157 = vector.load %arg16[%c0_71, %c0_72] : memref<1x64xf32, #tpu.memory_space<vmem>>, vector<1x64xf32>
    %158 = vector.shape_cast %157 : vector<1x64xf32> to vector<64xf32>
    %159 = vector.shape_cast %158 : vector<64xf32> to vector<1x64xf32>
    %160 = vector.broadcast %159 : vector<1x64xf32> to vector<8x64xf32>
    %161 = arith.addf %156, %160 : vector<8x64xf32>
    %cst_73 = arith.constant 5.000000e-01 : f32
    %162 = vector.broadcast %cst_73 : f32 to vector<8x64xf32>
    %163 = arith.mulf %162, %161 : vector<8x64xf32>
    %cst_74 = arith.constant 0.707106769 : f32
    %164 = vector.broadcast %cst_74 : f32 to vector<8x64xf32>
    %165 = arith.mulf %161, %164 : vector<8x64xf32>
    %166 = math.erf %165 : vector<8x64xf32>
    %cst_75 = arith.constant 1.000000e+00 : f32
    %167 = vector.broadcast %cst_75 : f32 to vector<8x64xf32>
    %168 = arith.addf %167, %166 : vector<8x64xf32>
    %169 = arith.mulf %163, %168 : vector<8x64xf32>
    %170 = arith.truncf %169 : vector<8x64xf32> to vector<8x64xbf16>
    %c0_76 = arith.constant 0 : index
    %c0_77 = arith.constant 0 : index
    %171 = vector.load %arg17[%c0_76, %c0_77] : memref<64x32xbf16, #tpu.memory_space<vmem>>, vector<64x32xbf16>
    %cst_78 = arith.constant dense<0.000000e+00> : vector<8x32xf32>
    %172 = tpu.matmul %170, %171, %cst_78 {dimension_numbers = #tpu.dot_dimension_numbers<[1], [0], [0], [1], [0, 0, 1, 1], [], []>} : vector<8x64xbf16>, vector<64x32xbf16>, vector<8x32xf32> -> vector<8x32xf32>
    %c0_79 = arith.constant 0 : index
    %c0_80 = arith.constant 0 : index
    %173 = vector.load %arg18[%c0_79, %c0_80] : memref<1x32xf32, #tpu.memory_space<vmem>>, vector<1x32xf32>
    %174 = vector.shape_cast %173 : vector<1x32xf32> to vector<32xf32>
    %175 = vector.shape_cast %174 : vector<32xf32> to vector<1x32xf32>
    %176 = vector.broadcast %175 : vector<1x32xf32> to vector<8x32xf32>
    %177 = arith.addf %172, %176 : vector<8x32xf32>
    %178 = arith.addf %177, %125 : vector<8x32xf32>
    %c0_81 = arith.constant 0 : index
    %c0_82 = arith.constant 0 : index
    %c0_83 = arith.constant 0 : index
    %179 = vector.load %arg19[%c0_81, %c0_82, %c0_83] : memref<1x8x32xf32, #tpu.memory_space<vmem>>, vector<1x8x32xf32>
    %180 = vector.shape_cast %179 : vector<1x8x32xf32> to vector<8x32xf32>
    %181 = vector.shape_cast %178 : vector<8x32xf32> to vector<1x8x32xf32>
    tpu.vector_store %arg19[%c0_81, %c0_82, %c0_83], %181 {strides = array<i32>} : memref<1x8x32xf32, #tpu.memory_space<vmem>>, vector<1x8x32xf32>,
    return
  }
  func.func @transform_0(%arg0: i32, %arg1: i32) -> (i32, i32, i32) {
    %c0_i32 = arith.constant 0 : i32
    %c0_i32_0 = arith.constant 0 : i32
    %c0_i32_1 = arith.constant 0 : i32
    return %arg0, %c0_i32, %c0_i32_0 : i32, i32, i32
  }
  func.func @transform_1(%arg0: i32, %arg1: i32) -> (i32, i32) {
    %c0_i32 = arith.constant 0 : i32
    %c0_i32_0 = arith.constant 0 : i32
    %c0_i32_1 = arith.constant 0 : i32
    return %c0_i32, %c0_i32_0 : i32, i32
  }
  func.func @transform_2(%arg0: i32, %arg1: i32) -> (i32, i32) {
    %c0_i32 = arith.constant 0 : i32
    %c0_i32_0 = arith.constant 0 : i32
    %c0_i32_1 = arith.constant 0 : i32
    return %c0_i32, %c0_i32_0 : i32, i32
  }
  func.func @transform_3(%arg0: i32, %arg1: i32) -> (i32, i32) {
    %c0_i32 = arith.constant 0 : i32
    %c0_i32_0 = arith.constant 0 : i32
    %c0_i32_1 = arith.constant 0 : i32
    return %c0_i32, %c0_i32_0 : i32, i32
  }
  func.func @transform_4(%arg0: i32, %arg1: i32) -> (i32, i32) {
    %c0_i32 = arith.constant 0 : i32
    %c0_i32_0 = arith.constant 0 : i32
    %c0_i32_1 = arith.constant 0 : i32
    return %c0_i32, %c0_i32_0 : i32, i32
  }
  func.func @transform_5(%arg0: i32, %arg1: i32) -> (i32, i32) {
    %c0_i32 = arith.constant 0 : i32
    %c0_i32_0 = arith.constant 0 : i32
    %c0_i32_1 = arith.constant 0 : i32
    return %c0_i32, %c0_i32_0 : i32, i32
  }
  func.func @transform_6(%arg0: i32, %arg1: i32) -> (i32, i32) {
    %c0_i32 = arith.constant 0 : i32
    %c0_i32_0 = arith.constant 0 : i32
    %c0_i32_1 = arith.constant 0 : i32
    return %c0_i32, %c0_i32_0 : i32, i32
  }
  func.func @transform_7(%arg0: i32, %arg1: i32) -> (i32, i32) {
    %c0_i32 = arith.constant 0 : i32
    %c0_i32_0 = arith.constant 0 : i32
    %c0_i32_1 = arith.constant 0 : i32
    return %c0_i32, %c0_i32_0 : i32, i32
  }
  func.func @transform_8(%arg0: i32, %arg1: i32) -> (i32, i32) {
    %c0_i32 = arith.constant 0 : i32
    %c0_i32_0 = arith.constant 0 : i32
    %c0_i32_1 = arith.constant 0 : i32
    return %c0_i32, %c0_i32_0 : i32, i32
  }
  func.func @transform_9(%arg0: i32, %arg1: i32) -> (i32, i32) {
    %c0_i32 = arith.constant 0 : i32
    %c0_i32_0 = arith.constant 0 : i32
    %c0_i32_1 = arith.constant 0 : i32
    return %c0_i32, %c0_i32_0 : i32, i32
  }
  func.func @transform_10(%arg0: i32, %arg1: i32) -> (i32, i32) {
    %c0_i32 = arith.constant 0 : i32
    %c0_i32_0 = arith.constant 0 : i32
    %c0_i32_1 = arith.constant 0 : i32
    return %c0_i32, %c0_i32_0 : i32, i32
  }
  func.func @transform_11(%arg0: i32, %arg1: i32) -> (i32, i32) {
    %c0_i32 = arith.constant 0 : i32
    %c0_i32_0 = arith.constant 0 : i32
    %c0_i32_1 = arith.constant 0 : i32
    return %c0_i32, %c0_i32_0 : i32, i32
  }
  func.func @transform_12(%arg0: i32, %arg1: i32) -> (i32, i32) {
    %c0_i32 = arith.constant 0 : i32
    %c0_i32_0 = arith.constant 0 : i32
    %c0_i32_1 = arith.constant 0 : i32
    return %c0_i32, %c0_i32_0 : i32, i32
  }
  func.func @transform_13(%arg0: i32, %arg1: i32) -> (i32, i32) {
    %c0_i32 = arith.constant 0 : i32
    %c0_i32_0 = arith.constant 0 : i32
    %c0_i32_1 = arith.constant 0 : i32
    return %c0_i32, %c0_i32_0 : i32, i32
  }
  func.func @transform_14(%arg0: i32, %arg1: i32) -> (i32, i32) {
    %c0_i32 = arith.constant 0 : i32
    %c0_i32_0 = arith.constant 0 : i32
    %c0_i32_1 = arith.constant 0 : i32
    return %c0_i32, %c0_i32_0 : i32, i32
  }
  func.func @transform_15(%arg0: i32, %arg1: i32) -> (i32, i32) {
    %c0_i32 = arith.constant 0 : i32
    %c0_i32_0 = arith.constant 0 : i32
    %c0_i32_1 = arith.constant 0 : i32
    return %c0_i32, %c0_i32_0 : i32, i32
  }
  func.func @transform_16(%arg0: i32, %arg1: i32) -> (i32, i32) {
    %c0_i32 = arith.constant 0 : i32
    %c0_i32_0 = arith.constant 0 : i32
    %c0_i32_1 = arith.constant 0 : i32
    return %c0_i32, %c0_i32_0 : i32, i32
  }
  func.func @transform_17(%arg0: i32, %arg1: i32) -> (i32, i32, i32) {
    %c0_i32 = arith.constant 0 : i32
    %c0_i32_0 = arith.constant 0 : i32
    return %arg0, %arg1, %c0_i32 : i32, i32, i32
  }
}

</mosaic_0001>

<bundles_post_ra>
// kernel: tpu_custom_call.1
= control target key start
LH: loop header
LB: loop body
LE: loop exit
PB: predicated region body
PF: predicated region fallthrough
CT: control target
= control target key end

     0   :  { %s2677_s0 = inlined_call_operand.vmem [shape: f32[2,8,32], index: 0, kind: input, shape index: {}]   ;;  %s2678_s1 = inlined_call_operand.vmem [shape: f32[1,32], index: 1, kind: input, shape index: {}]   ;;  %s2679_s2 = inlined_call_operand.vmem [shape: f32[1,32], index: 2, kind: input, shape index: {}]   ;;  %s2680_s3 = inlined_call_operand.vmem [shape: bf16[32,32], index: 3, kind: input, shape index: {}]   ;;  %s2681_s4 = inlined_call_operand.vmem [shape: f32[1,32], index: 4, kind: input, shape index: {}]   ;;  %s2682_s5 = inlined_call_operand.vmem [shape: bf16[32,32], index: 5, kind: input, shape index: {}]   ;;  %s2683_s6 = inlined_call_operand.vmem [shape: f32[1,32], index: 6, kind: input, shape index: {}]   ;;  %s2684_s7 = inlined_call_operand.hbm [shape: bf16[32,32], index: 7, kind: input, shape index: {}]   ;;  %s2685_s8 = inlined_call_operand.vmem [shape: f32[1,32], index: 8, kind: input, shape index: {}]   ;;  %s2686_s9 = inlined_call_operand.hbm [shape: bf16[32,32], index: 9, kind: input, shape index: {}]   ;;  %s2687_s10 = inlined_call_operand.vmem [shape: f32[1,32], index: 10, kind: input, shape index: {}]   ;;  %s2688_s11 = inlined_call_operand.vmem [shape: f32[1,32], index: 11, kind: input, shape index: {}]   ;;  %s2689_s12 = inlined_call_operand.vmem [shape: f32[1,32], index: 12, kind: input, shape index: {}]   ;;  %s2690_s13 = inlined_call_operand.hbm [shape: bf16[32,64], index: 13, kind: input, shape index: {}]   ;;  %s2691_s14 = inlined_call_operand.vmem [shape: f32[1,64], index: 14, kind: input, shape index: {}]   ;;  %s2692_s15 = inlined_call_operand.vmem [shape: bf16[64,32], index: 15, kind: input, shape index: {}]   ;;  %s2693_s16 = inlined_call_operand.vmem [shape: f32[1,32], index: 16, kind: input, shape index: {}]   ;;  %s2694_s17 = inlined_call_operand.hbm [shape: f32[2,8,32], index: 17, kind: output, shape index: {}]  }
   0x1   :  { %2702 = sst [smem:[#allocation22_spill]] %s2677_s0 }
   0x2   :  { %2703 = sst [smem:[#allocation23_spill]] %s2678_s1 }
   0x3   :  { %22 = vsyncpa [#allocation6], 0 }
   0x4   :  { %23 = vsyncpa [#allocation9], 0 }
   0x5   :  { %24 = vsyncpa [#allocation7], 0 }
   0x6   :  { %26 = vsyncpa [#allocation7 + $0x1], 0  ;;  %s2355_s24 = smov 0   ;;  %s2357_s25 = smov 0  }
   0x7   :  { %s2359_s26 = smov 0   ;;  %s2361_s27 = smov 0  }
   0x8   :  { %s2363_s28 = smov 0   ;;  %s2365_s29 = smov 0  }
   0x9 LB: > { %2704 = sst [smem:[#allocation15_spill]] %s2229_s24  ;;  %s1743_s0 = sadd.s32 4294967295, %s2249_s29   ;;  %s2249_s29 = sphi %s2365_s29, %s32_s29   ;;  %s2245_s28 = sphi %s2363_s28, %s2725_s28   ;;  %s2241_s27 = sphi %s2361_s27, %s2724_s27   ;;  %s2237_s26 = sphi %s2359_s26, %s2723_s26   ;;  %s2233_s25 = sphi %s2357_s25, %s2727_s25   ;;  %s2229_s24 = sphi %s2355_s24, %s2726_s24  }
   0xa   : > { %2705 = sst [smem:[#allocation16_spill]] %s2237_s26  ;;  %s1744_s30 = sadd.s32 4294967294, %s2249_s29  }
   0xb   : > { %2706 = sst [smem:[#allocation17_spill]] %s2245_s28  ;;  %s44_s18 = sadd.s32 1, %s2245_s28 }
   0xc   : > { %2707 = sst [smem:[#allocation18_spill]] %s2249_s29  ;;  %s415_s19 = sadd.s32 1, %s2237_s26 }
   0xd   : > { %p46_p0 = scmp.ge.s32.totalorder %s44_s18, 2  ;;  %p425_p1 = scmp.ne.s32.totalorder %s2237_s26, %s2233_s25 }
   0xe   : > { %p426_p2 = scmp.eq.s32.totalorder %s1743_s0, 1  ;;  %p431_p3 = scmp.ne.s32.totalorder %s2233_s25, %s2229_s24 }
   0xf   : > { %s2729_s18 = smov (%p46_p0, %s44_s18), 0  ;;  %p432_p5 = scmp.eq.s32.totalorder %s1744_s30, 1 }
  0x10   : > { %2708 = sst [smem:[#allocation19_spill]] %s2729_s18  ;;  %p2395_p4 = por %p426_p2, %p425_p1 }
  0x11   : > { %s410_s20 = ssub.s32 %s2245_s28, %s2729_s18  ;;  %p1745_p6 = scmp.ge.s32.totalorder %s2249_s29, 1 }
  0x12   : > { %p413_p7 = scmp.eq.s32.totalorder %s410_s20, 0  ;;  %p2402_p8 = por %p432_p5, %p431_p3 }
  0x13   : > { %p439_p9 = scmp.lt.s32.totalorder %s2249_s29, 3  ;;  %p2414_p11 = scmp.eq.s32.totalorder %s1743_s0, 0 }
  0x14   : > { %s2710_s21 = scalar_select %p2402_p8, 1, 0 }
  0x15   : > { %s2408_s22 = scalar_select %p413_p7, %s2237_s26, %s415_s19  }
  0x16   : > { %2711 = sst [smem:[#allocation20_spill]] %s2710_s21  ;;  %p2410_p10 = pnand %p1745_p6, %p439_p9 }
  0x17   : > { %2712 = sst [smem:[#allocation21_spill]] %s2408_s22  ;;  %s2251_s30 = smov [#allocation8]  }
  0x18   : > { %p1961_p12 = pneg %p2410_p10  ;;  %s492_s20 = sshll.u32 %s2251_s30, 4  ;;  %s493_s20 = int_to_ptr.vmem [resolvable:$true] %s492_s20 }
  0x19   : > { %s2252_s19 = smov [#allocation5]   ;;  %s2098_s0 = scalar_lea.vmem %s493_s20, 256 }
  0x1a   : > { %p2422_p13 = pnand %p2414_p11, %p1961_p12  ;;  %s476_s28 = sshll.u32 %s2252_s19, 4  ;;  %s477_s28 = int_to_ptr.vmem [resolvable:$true] %s476_s28 }
  0x1b   : > { %p2099_p1 = scmp.ne.s32.totalorder %s493_s20, %s2098_s0  ;;  %p2106_p5 = scmp.lt.s32.totalorder %s493_s20, %s493_s20 }
  0x1c   : > { %p2089_p0 = pneg %p2422_p13  ;;  %p2107_p6 = scmp.lt.s32.totalorder %s2098_s0, %s2098_s0 }
  0x1e   : > { %p2101_p2 = pnand %p2099_p1, %p2089_p0  ;;  %p2108_p7 = por %p2107_p6, %p2106_p5 }
  0x20   : > { %p2102_p3 = pneg %p2101_p2 }
  0x22   : > { %p2109_p9 = pnand %p2108_p7, %p2102_p3 }
  0x24   : > { %2112 = shalt.err (!%p2109_p9)
}
  0x25   : > { %s2253_s30 = smov 64   ;;  %s2254_s22 = smov 4  }
  0x26   : > { %1967 = dma.hbm_to_vmem [thread:$0]  (!%p2422_p13), %s2686_s9, 256, %s493_s20, [#allocation9], %s2253_s30, %s2253_s30, %s2254_s22  }
  0x27   : > { %s2124_s21 = scalar_lea.vmem %s477_s28, 256  ;;  %p2132_p8 = scmp.lt.s32.totalorder %s477_s28, %s477_s28 }
  0x28   : > { %p2125_p12 = scmp.ne.s32.totalorder %s477_s28, %s2124_s21  ;;  %p2133_p5 = scmp.lt.s32.totalorder %s2124_s21, %s2124_s21 }
  0x2a   : > { %p2127_p1 = pnand %p2125_p12, %p2089_p0  ;;  %p2134_p3 = por %p2133_p5, %p2132_p8 }
  0x2c   : > { %p2128_p2 = pneg %p2127_p1 }
  0x2e   : > { %p2135_p6 = pnand %p2134_p3, %p2128_p2 }
  0x30   : > { %2138 = shalt.err (!%p2135_p6)
}
  0x31   : > { %1964 = dma.hbm_to_vmem [thread:$0]  (!%p2422_p13), %s2684_s7, 256, %s477_s28, [#allocation6], %s2253_s30, %s2253_s30, %s2254_s22  }
  0x32   : > { %s2255_s26 = smov [#allocation10]  }
  0x33   : > { %s514_s20 = sshll.u32 %s2255_s26, 4  ;;  %s515_s20 = int_to_ptr.vmem [resolvable:$true] %s514_s20 }
  0x34   : > { %s2150_s19 = scalar_lea.vmem %s515_s20, 256  ;;  %p2158_p1 = scmp.lt.s32.totalorder %s515_s20, %s515_s20 }
  0x35   : > { %p2151_p7 = scmp.ne.s32.totalorder %s515_s20, %s2150_s19  ;;  %p2159_p8 = scmp.lt.s32.totalorder %s2150_s19, %s2150_s19 }
  0x37   : > { %p2153_p9 = pnand %p2151_p7, %p2089_p0  ;;  %p2160_p2 = por %p2159_p8, %p2158_p1 }
  0x39   : > { %p2154_p12 = pneg %p2153_p9 }
  0x3b   : > { %p2161_p5 = pnand %p2160_p2, %p2154_p12 }
  0x3d   : > { %2164 = shalt.err (!%p2161_p5)
}
  0x3e   : > { %1970 = dma.hbm_to_vmem [thread:$0]  (!%p2422_p13), %s2690_s13, 256, %s515_s20, [#allocation9], %s2253_s30, %s2253_s30, %s2254_s22  }
  0x3f   : > { %539 = sbr.rel (%p2410_p10) target bundleno = 2532 (0x9e4), region = 88 }
  0x44   : > { %2216 = dma.done.wait (%p2414_p11), [#allocation6], 256  }
  0x45   : > { %2218 = vsyncadd (%p2414_p11), [#allocation6], 4294967040 }
  0x46   : > { %2220 = dma.done.wait (%p2414_p11), [#allocation9], 512  }
  0x47   : > { %2222 = vsyncadd (%p2414_p11), [#allocation9], 4294966784  ;;  %p598_p0 = scmp.lt.s32.totalorder %s2241_s27, 1  ;;  %s2716_s30 = sld [smem:[#allocation22_spill]]  ;;  %vm610_vm0 = vcmask 261120   ;;  %v2043_v12 = vld [vmem:[%s2682_s5 + $0x8] sm:$0xff]  }
  0x48   : > { %v2044_v13 = vld [vmem:[#allocation5 + $0x8] sm:$0xff]   ;;  %v2256_v14 = vmov 0.0   ;;  %v2045_v15 = vld [vmem:[%s2682_s5] sm:$0xff]   ;;  %v2046_v16 = vld [vmem:[#allocation5] sm:$0xff]   ;;  %vm2257_vm1 = vmmov 0   ;;  %vm770_vm2 = vcmask 257024  }
  0x49   : > { %s599_s28 = scalar_select %p598_p0, %s2241_s27, 1  ;;  %1847 = vmatprep.subr.bf16.mxu0 %v2256_v14  ;;  %1855 = vmatprep.subr.bf16.mxu1 %v2256_v14  ;;  %v1756_v26 = vld [vmem:[%s2679_s2] ss:$0 sm:$0xff]  ;;  %v2047_v31 = vld [vmem:[%s2680_s3 + $0x8] sm:$0xff]   ;;  %vm878_vm3 = vcmask 64512   ;;  %vm940_vm4 = vcmask 1043456  }
  0x4a   : > { %1848 = vmatpush3.bf16.msra.mxu0 %v2043_v12  ;;  %1856 = vmatpush3.bf16.msra.mxu1 %v2044_v13  ;;  %v2048_v34 = vld [vmem:[%s2680_s3] sm:$0xff]   ;;  %s2259_s22 = smov 112   ;;  %s2260_s23 = smov 104   ;;  %vm985_vm5 = vcmask 60416   ;;  %vm1113_vm6 = vcmask 126016   ;;  %vm1240_vm7 = vcmask 191616  }
  0x4b   : > { %s1754_s18 = sshll.u32 %s599_s28, 3  ;;  %1849 = vmatprep.subr.bf16.mxu0 %v2256_v14  ;;  %1857 = vmatprep.subr.bf16.mxu1 %v2256_v14  ;;  %s2717_s28 = sld [smem:[#allocation23_spill]]  ;;  %v1757_v37 = vld [vmem:[%s2683_s6] ss:$0 sm:$0xff]  ;;  %vm1367_vm8 = vcmask 257216   ;;  %vm1578_vm9 = vcmask 523264  }
  0x4c   : > { %1851 = vmatprep.mubr.msk.bf16.mxu0 %vm2257_vm1, %v2256_v14  ;;  %1859 = vmatprep.mubr.msk.bf16.mxu1 %vm2257_vm1, %v2256_v14  ;;  %v1761_v38 = vld [vmem:[%s2685_s8] ss:$0 sm:$0xff]  ;;  %s2263_s24 = smov 24   ;;  %s595_s29 = sand.u32 1, %s2233_s25  }
  0x4d   : > { %s601_s0 = scalar_lea.vmem %s2716_s30, %s1754_s18  ;;  %v1767_v51 = vld [vmem:[%s2681_s4] ss:$0 sm:$0xff]  ;;  %s2258_s18 = smov 120  }
  0x4e   : > { %v2467_v0 = vld [vmem:[%s601_s0] sm:$0xff]  ;;  %1850 = vmatpush3.bf16.msra.mxu0 %v2045_v15  ;;  %1858 = vmatpush3.bf16.msra.mxu1 %v2046_v16  ;;  %s2261_s30 = smov 8   ;;  %s2262_s0 = smov 16  }
  0x4f   : > { %v611_v1 = vsel %vm610_vm0, %v2467_v0, 0.0  ;;  %1863 = vmatprep.subr.bf16.mxu0 %v2256_v14  ;;  %1871 = vmatprep.subr.bf16.mxu1 %v2256_v14  ;;  %s2264_s21 = smov [#allocation11]  }
  0x50   : > { %612 = vadd.xlane.f32.xlu0 %v611_v1 }
  0x51   : > { %v1755_v24 = vld [vmem:[%s2717_s28] ss:$0 sm:$0xff]  ;;  %s1753_s28 = sshll.u32 %s595_s29, 3 }
  0x54   : > { %781 = vadd.xlane.f32.xlu0 %v611_v1 }
  0xd9   : > { %v613_v2 = vpop.xlane.xlu0 %612 }
  0xda   : > { %v615_v3 = vmul.f32 0.03125, %v613_v2 }
  0xdc   : > { %v616_v4 = vsub.f32 %v2467_v0, %v615_v3 }
  0xdd   : > { %v782_v5 = vpop.xlane.xlu0 %781 }
  0xde   : > { %v784_v6 = vmul.f32 0.03125, %v782_v5  ;;  %v617_v7 = vmul.f32 %v616_v4, %v616_v4 }
  0xe0   : > { %v785_v8 = vsub.f32 %v2467_v0, %v784_v6  ;;  %v618_v9 = vsel %vm610_vm0, %v617_v7, 0.0 }
  0xe1   : > { %619 = vadd.xlane.f32.xlu1 %v618_v9 }
  0xe2   : > { %v786_v10 = vmul.f32 %v785_v8, %v785_v8 }
  0xe4   : > { %v787_v11 = vsel %vm610_vm0, %v786_v10, 0.0 }
  0xe5   : > { %788 = vadd.xlane.f32.xlu1 %v787_v11 }
 0x16a   : > { %v620_v17 = vpop.xlane.xlu1 %619 }
 0x16b   : > { %v621_v18 = vmul.f32 0.03125, %v620_v17 }
 0x16d   : > { %v622_v19 = vadd.f32 1e-05, %v621_v18 }
 0x16e   : > { %v789_v20 = vpop.xlane.xlu1 %788 }
 0x16f   : > { %2063 = vrsqrt.f32 %v622_v19  ;;  %v790_v21 = vmul.f32 0.03125, %v789_v20 }
 0x171   : > { %v791_v22 = vadd.f32 1e-05, %v790_v21 }
 0x173   : > { %2065 = vrsqrt.f32 %v791_v22 }
 0x17c   : > { %v2064_v23 = vpop.eup %2063 }
 0x17d   : > { %v624_v25 = vmul.f32 %v2064_v23, %v616_v4 }
 0x17f   : > { %v631_v27 = vmul.f32 %v1755_v24, %v624_v25 }
 0x180   : > { %v2066_v28 = vpop.eup %2065 }
 0x181   : > { %v793_v29 = vmul.f32 %v2066_v28, %v785_v8  ;;  %v638_v30 = vadd.f32 %v1756_v26, %v631_v27 }
 0x183   : > { %v639_v32 = vpack.c.bf16 %v638_v30, %v638_v30  ;;  %v800_v33 = vmul.f32 %v1755_v24, %v793_v29 }
 0x185   : > { %1852 = vmatmul.mubr.msk.bf16.vlgmr.msra.gmra.mxu0 %vm610_vm0, %v639_v32  ;;  %1860 = vmatmul.mubr.msk.bf16.vlgmr.msra.gmra.mxu1 %vm610_vm0, %v639_v32  ;;  %v807_v35 = vadd.f32 %v1756_v26, %v800_v33 }
 0x186   : > { %1864 = vmatpush3.bf16.msra.mxu0 %v2047_v31  ;;  %1867 = vmatprep.mubr.msk.bf16.mxu0 %vm2257_vm1, %v2256_v14 }
 0x187   : > { %1865 = vmatprep.subr.bf16.mxu0 %v2256_v14  ;;  %1873 = vmatprep.mubr.msk.bf16.mxu1 %vm2257_vm1, %v2256_v14  ;;  %v808_v36 = vpack.c.bf16 %v807_v35, %v807_v35 }
 0x18a   : > { %1866 = vmatpush3.bf16.msra.mxu0 %v2048_v34 }
 0x18b   : > { %1877 = vmatprep.subr.bf16.mxu0 %v2256_v14 }
 0x18d   : > { %1868 = vmatmul.mubr.msk.bf16.vlgmr.msra.gmra.mxu0 %vm610_vm0, %v808_v36 }
 0x18e   : > { %1879 = vmatprep.mubr.msk.bf16.mxu0 %vm2257_vm1, %v2256_v14 }
 0x245   : > { %v700_v39 = vpop.f32.mrf.mxu0  ;;  %v763_v40 = vpop.f32.mrf.mxu1 }
 0x246   : > { %v701_v41 = vadd.f32 %v1757_v37, %v700_v39  ;;  %v764_v42 = vadd.f32 %v1761_v38, %v763_v40 }
 0x247   : > { %v1853_v43 = vpop.f32.mrf.mxu0  ;;  %v1861_v44 = vpop.f32.mrf.mxu1 }
 0x248   : > { %v769_v45 = vpack.c.bf16 %v701_v41, %v701_v41  ;;  %v772_v46 = vpack.c.bf16 %v764_v42, %v764_v42 }
 0x249   : > { %v703_v47 = vpop.f32.mrf.mxu0  ;;  %v766_v48 = vpop.f32.mrf.mxu1 }
 0x24a   : > { %771 = vst.msk [vmem:[#allocation2] sm:$0xf] %vm770_vm2, %v769_v45  ;;  %773 = vst.msk [vmem:[#allocation3] sm:$0xf] %vm770_vm2, %v772_v46 }
 0x24b   : > { %v1854_v49 = vpop.f32.mrf.mxu0  ;;  %v1862_v50 = vpop.f32.mrf.mxu1 }
 0x24d   : > { %v869_v52 = vpop.f32.mrf.mxu0 }
 0x24e   : > { %v870_v53 = vadd.f32 %v1767_v51, %v869_v52 }
 0x24f   : > { %v1869_v54 = vpop.f32.mrf.mxu0 }
 0x250   : > { %v875_v55 = vpack.c.bf16 %v870_v53, %v870_v53 }
 0x251   : > { %v872_v56 = vpop.f32.mrf.mxu0  ;;  %v876_v57 = vld [vmem:[#allocation2] sm:$0xf]  ;;  %v877_v58 = vld [vmem:[#allocation3] sm:$0xf] }
 0x252   : > { %990 = vrot.lane.b32.xlu1 %v875_v55, %s2258_s18  ;;  %v883_v59 = vsel %vm878_vm3, %v876_v57, 0  ;;  %v942_v60 = vsel %vm940_vm4, %v877_v58, 0  ;;  %v2049_v61 = vld [vmem:[#allocation2] ss:$0 sps:$4 sm:$0xff]   ;;  %v2052_v47 = vld [vmem:[#allocation3] ss:$0 sps:$4 sm:$0xff]  }
 0x253   : > { %v1870_v62 = vpop.f32.mrf.mxu0  ;;  %1872 = vmatpush3.bf16.xpose.msra.mxu1 %v883_v59  ;;  %1878 = vmatpush3.bf16.msra.mxu0 %v942_v60  ;;  %v2050_v63 = vld [vmem:[#allocation2] ss:$0 sps:$4 sm:$0xff]   ;;  %v2053_v51 = vld [vmem:[#allocation3] ss:$0 sps:$4 sm:$0xff]  }
 0x254   : > { %995 = vrot.lane.b32.xlu0 %v2049_v61, %s2258_s18  ;;  %1883 = vmatprep.subr.bf16.mxu1 %v2256_v14  ;;  %v2051_v1 = vld [vmem:[#allocation2] ss:$0 sps:$4 sm:$0xff]   ;;  %v2054_v58 = vld [vmem:[#allocation3] ss:$0 sps:$4 sm:$0xff]  }
 0x255   : > { %1889 = vmatprep.subr.bf16.mxu0 %v2256_v14 }
 0x256   : > { %1122 = vrot.lane.b32.xlu1 %v2050_v63, %s2259_s22 }
 0x258   : > { %1249 = vrot.lane.b32.xlu0 %v2051_v1, %s2260_s23 }
 0x25a   : > { %1117 = vrot.lane.b32.xlu1 %v875_v55, %s2259_s22  ;;  %1874 = vmatmul.mubr.msk.bf16.vlgmr.msra.gmra.mxu1 %vm878_vm3, %v875_v55 }
 0x25b   : > { %1885 = vmatprep.mubr.msk.bf16.mxu1 %vm2257_vm1, %v2256_v14 }
 0x25e   : > { %1244 = vrot.lane.b32.xlu1 %v875_v55, %s2260_s23 }
 0x2c4   : > { %v991_v2 = vpop.permute.xlu1 %990 }
 0x2c6   : > { %v996_v3 = vpop.permute.xlu0 %995 }
 0x2c7   : > { %v1001_v4 = vsel %vm878_vm3, %v996_v3, 0 }
 0x2c8   : > { %1884 = vmatpush3.bf16.xpose.msra.mxu1 %v1001_v4  ;;  %v1123_v5 = vpop.permute.xlu1 %1122 }
 0x2c9   : > { %1895 = vmatprep.subr.bf16.mxu1 %v2256_v14  ;;  %v1128_v6 = vsel %vm878_vm3, %v1123_v5, 0 }
 0x2ca   : > { %v1250_v7 = vpop.permute.xlu0 %1249 }
 0x2cb   : > { %v1255_v9 = vsel %vm878_vm3, %v1250_v7, 0 }
 0x2cc   : > { %v1118_v8 = vpop.permute.xlu1 %1117 }
 0x2cf   : > { %1886 = vmatmul.mubr.msk.bf16.vlgmr.msra.gmra.mxu1 %vm878_vm3, %v991_v2 }
 0x2d0   : > { %1896 = vmatpush3.bf16.xpose.msra.mxu1 %v1128_v6  ;;  %1897 = vmatprep.mubr.msk.bf16.mxu1 %vm2257_vm1, %v2256_v14  ;;  %v1245_v10 = vpop.permute.xlu1 %1244 }
 0x2d1   : > { %1907 = vmatprep.subr.bf16.mxu1 %v2256_v14 }
 0x2d7   : > { %1898 = vmatmul.mubr.msk.bf16.vlgmr.msra.gmra.mxu1 %vm878_vm3, %v1118_v8 }
 0x2d8   : > { %1908 = vmatpush3.bf16.xpose.msra.mxu1 %v1255_v9  ;;  %1909 = vmatprep.mubr.msk.bf16.mxu1 %vm2257_vm1, %v2256_v14 }
 0x2d9   : > { %1919 = vmatprep.subr.bf16.mxu1 %v2256_v14 }
 0x2df   : > { %1910 = vmatmul.mubr.msk.bf16.vlgmr.msra.gmra.mxu1 %vm878_vm3, %v1245_v10 }
 0x2e0   : > { %1923 = vmatprep.mubr.msk.bf16.mxu1 %vm2257_vm1, %v2256_v14 }
 0x31a   : > { %v919_v11 = vpop.f32.mrf.mxu1 }
 0x31b   : > { %v925_v12 = vsel %vm878_vm3, %v919_v11, -inf }
 0x31c   : > { %926 = vmax.xlane.f32.xlu0 %v925_v12  ;;  %v1875_v13 = vpop.f32.mrf.mxu1 }
 0x31e   : > { %v922_v15 = vpop.f32.mrf.mxu1 }
 0x320   : > { %v1876_v16 = vpop.f32.mrf.mxu1 }
 0x38f   : > { %v1037_v17 = vpop.f32.mrf.mxu1 }
 0x390   : > { %v1043_v18 = vsel %vm878_vm3, %v1037_v17, -inf }
 0x391   : > { %1044 = vmax.xlane.f32.xlu1 %v1043_v18  ;;  %v1887_v19 = vpop.f32.mrf.mxu1 }
 0x393   : > { %v1040_v20 = vpop.f32.mrf.mxu1 }
 0x395   : > { %v1888_v21 = vpop.f32.mrf.mxu1 }
 0x397   : > { %v1164_v22 = vpop.f32.mrf.mxu1 }
 0x398   : > { %v1170_v23 = vsel %vm878_vm3, %v1164_v22, -inf }
 0x399   : > { %1171 = vmax.xlane.f32.xlu0 %v1170_v23  ;;  %v1899_v24 = vpop.f32.mrf.mxu1 }
 0x39b   : > { %v1167_v25 = vpop.f32.mrf.mxu1 }
 0x39d   : > { %v1900_v26 = vpop.f32.mrf.mxu1 }
 0x39f   : > { %v1291_v27 = vpop.f32.mrf.mxu1 }
 0x3a0   : > { %v1297_v28 = vsel %vm878_vm3, %v1291_v27, -inf }
 0x3a1   : > { %1298 = vmax.xlane.f32.xlu0 %v1297_v28  ;;  %v1911_v29 = vpop.f32.mrf.mxu1 }
 0x3a3   : > { %v1294_v30 = vpop.f32.mrf.mxu1 }
 0x3a4   : > { %v2055_v30 = vld [vmem:[#allocation8 + $0x8] sm:$0xff]  }
 0x3a5   : > { %v1912_v31 = vpop.f32.mrf.mxu1  ;;  %v927_v32 = vpop.xlane.xlu0 %926  ;;  %1920 = vmatpush3.bf16.msra.mxu1 %v2055_v30 }
 0x3a6   : > { %v928_v33 = vsub.f32 %v919_v11, %v927_v32  ;;  %v2056_v31 = vld [vmem:[#allocation8] sm:$0xff]   ;;  %1921 = vmatprep.subr.bf16.mxu1 %v2256_v14 }
 0x3a8   : > { %v929_v34 = vmul.f32 1.442695, %v928_v33 }
 0x3a9   : > { %1922 = vmatpush3.bf16.msra.mxu1 %v2056_v31 }
 0x3aa   : > { %2067 = vpow2.f32 %v929_v34  ;;  %1935 = vmatprep.subr.bf16.mxu1 %v2256_v14 }
 0x3b7   : > { %v2068_v35 = vpop.eup %2067 }
 0x3b8   : > { %v931_v36 = vsel %vm878_vm3, %v2068_v35, 0.0 }
 0x3b9   : > { %932 = vadd.xlane.f32.xlu0 %v931_v36 }
 0x41a   : > { %v1045_v37 = vpop.xlane.xlu1 %1044 }
 0x41b   : > { %v1046_v38 = vsub.f32 %v1037_v17, %v1045_v37 }
 0x41d   : > { %v1047_v39 = vmul.f32 1.442695, %v1046_v38 }
 0x41f   : > { %2069 = vpow2.f32 %v1047_v39 }
 0x422   : > { %v1172_v40 = vpop.xlane.xlu0 %1171 }
 0x423   : > { %v1173_v41 = vsub.f32 %v1164_v22, %v1172_v40 }
 0x425   : > { %v1174_v42 = vmul.f32 1.442695, %v1173_v41  ;;  %v1788_v41 = vld [vmem:[%s2687_s10] ss:$0 sm:$0xff] }
 0x427   : > { %2071 = vpow2.f32 %v1174_v42 }
 0x42a   : > { %v1299_v48 = vpop.xlane.xlu0 %1298 }
 0x42b   : > { %v1300_v50 = vsub.f32 %v1291_v27, %v1299_v48 }
 0x42c   : > { %v2070_v43 = vpop.eup %2069 }
 0x42d   : > { %v1049_v44 = vsel %vm878_vm3, %v2070_v43, 0.0  ;;  %v1301_v52 = vmul.f32 1.442695, %v1300_v50 }
 0x42e   : > { %1050 = vadd.xlane.f32.xlu1 %v1049_v44 }
 0x434   : > { %v2072_v45 = vpop.eup %2071 }
 0x435   : > { %v1176_v46 = vsel %vm878_vm3, %v2072_v45, 0.0 }
 0x436   : > { %1177 = vadd.xlane.f32.xlu0 %v1176_v46 }
 0x43f   : > { %1185 = vrot.lane.b32.xlu1 %v2052_v47, %s2259_s22 }
 0x442   : > { %v933_v49 = vpop.xlane.xlu0 %932 }
 0x443   : > { %2073 = vrcp.f32 %v933_v49 }
 0x444   : > { %2075 = vpow2.f32 %v1301_v52 }
 0x44c   : > { %1058 = vrot.lane.b32.xlu0 %v2053_v51, %s2258_s18 }
 0x450   : > { %v2074_v53 = vpop.eup %2073 }
 0x451   : > { %v935_v54 = vmul.f32 %v2074_v53, %v2068_v35  ;;  %v2076_v56 = vpop.eup %2075 }
 0x452   : > { %v1303_v57 = vsel %vm878_vm3, %v2076_v56, 0.0 }
 0x453   : > { %v936_v55 = vpack.c.bf16 %v935_v54, %v935_v54  ;;  %v2057_v54 = vld [vmem:[#allocation10 + $0x8] sm:$0xff]  }
 0x455   : > { %1880 = vmatmul.mubr.msk.bf16.vlgmr.msra.gmra.mxu0 %vm878_vm3, %v936_v55  ;;  %v2058_v55 = vld [vmem:[#allocation10] sm:$0xff]  }
 0x456   : > { %1891 = vmatprep.mubr.msk.bf16.mxu0 %vm2257_vm1, %v2256_v14 }
 0x463   : > { %1304 = vadd.xlane.f32.xlu1 %v1303_v57 }
 0x474   : > { %1312 = vrot.lane.b32.xlu1 %v2054_v58, %s2260_s23  ;;  %s1805_s23 = sshll.u32 %s2241_s27, 7  ;;  %s1625_s27 = scalar_lea.sflag [#allocation7], %s595_s29 }
 0x475   : > { %s2630_s20 = scalar_lea.hbm %s2694_s17, %s1805_s23 }
 0x4b7   : > { %v1051_v59 = vpop.xlane.xlu1 %1050 }
 0x4b8   : > { %2077 = vrcp.f32 %v1051_v59  ;;  %v1792_v59 = vld [vmem:[%s2688_s11] ss:$0 sm:$0xff] }
 0x4bb   : > { %v1186_v2 = vpop.permute.xlu1 %1185 }
 0x4bc   : > { %v1191_v4 = vsel %vm940_vm4, %v1186_v2, 0  ;;  %v2059_v2 = vld [vmem:[%s2692_s15 + $0x18] sm:$0xff]  }
 0x4bf   : > { %v1178_v60 = vpop.xlane.xlu0 %1177 }
 0x4c0   : > { %2079 = vrcp.f32 %v1178_v60 }
 0x4c3   : > { %v1059_v61 = vpop.permute.xlu0 %1058 }
 0x4c4   : > { %v1064_v62 = vsel %vm940_vm4, %v1059_v61, 0  ;;  %v1793_v61 = vld [vmem:[%s2689_s12] ss:$0 sm:$0xff] }
 0x4c5   : > { %v2078_v63 = vpop.eup %2077  ;;  %1890 = vmatpush3.bf16.msra.mxu0 %v1064_v62 }
 0x4c6   : > { %1901 = vmatprep.subr.bf16.mxu0 %v2256_v14  ;;  %v1053_v1 = vmul.f32 %v2078_v63, %v2070_v43 }
 0x4c8   : > { %v1054_v3 = vpack.c.bf16 %v1053_v1, %v1053_v1 }
 0x4ca   : > { %1892 = vmatmul.mubr.msk.bf16.vlgmr.msra.gmra.mxu0 %vm878_vm3, %v1054_v3  ;;  %v2060_v3 = vld [vmem:[%s2692_s15 + $0x10] sm:$0xff]  }
 0x4cb   : > { %1902 = vmatpush3.bf16.msra.mxu0 %v1191_v4  ;;  %1903 = vmatprep.mubr.msk.bf16.mxu0 %vm2257_vm1, %v2256_v14  ;;  %v2061_v4 = vld [vmem:[%s2692_s15 + $0x8] sm:$0xff]  }
 0x4cc   : > { %1913 = vmatprep.subr.bf16.mxu0 %v2256_v14 }
 0x4cd   : > { %v2080_v5 = vpop.eup %2079 }
 0x4ce   : > { %v1180_v6 = vmul.f32 %v2080_v5, %v2072_v45  ;;  %v2062_v5 = vld [vmem:[%s2692_s15] sm:$0xff]  }
 0x4d0   : > { %v1181_v7 = vpack.c.bf16 %v1180_v6, %v1180_v6  ;;  %v1794_v6 = vld [vmem:[%s2691_s14] ss:$0 sm:$0xff] }
 0x4d2   : > { %1904 = vmatmul.mubr.msk.bf16.vlgmr.msra.gmra.mxu0 %vm878_vm3, %v1181_v7 }
 0x4d3   : > { %1915 = vmatprep.mubr.msk.bf16.mxu0 %vm2257_vm1, %v2256_v14 }
 0x4ec   : > { %v1305_v8 = vpop.xlane.xlu1 %1304 }
 0x4ed   : > { %2081 = vrcp.f32 %v1305_v8 }
 0x4f0   : > { %v1313_v9 = vpop.permute.xlu1 %1312 }
 0x4f1   : > { %v1318_v10 = vsel %vm940_vm4, %v1313_v9, 0 }
 0x4f2   : > { %1914 = vmatpush3.bf16.msra.mxu0 %v1318_v10 }
 0x4f3   : > { %1927 = vmatprep.subr.bf16.mxu0 %v2256_v14 }
 0x4fa   : > { %v2082_v11 = vpop.eup %2081 }
 0x4fb   : > { %v1307_v12 = vmul.f32 %v2082_v11, %v2076_v56 }
 0x4fd   : > { %v1308_v13 = vpack.c.bf16 %v1307_v12, %v1307_v12 }
 0x4ff   : > { %1916 = vmatmul.mubr.msk.bf16.vlgmr.msra.gmra.mxu0 %vm878_vm3, %v1308_v13 }
 0x500   : > { %1931 = vmatprep.mubr.msk.bf16.mxu0 %vm2257_vm1, %v2256_v14  ;;  %1928 = vmatpush3.bf16.msra.mxu0 %v2057_v54 }
 0x501   : > { %1929 = vmatprep.subr.bf16.mxu0 %v2256_v14 }
 0x504   : > { %1930 = vmatpush3.bf16.msra.mxu0 %v2058_v55 }
 0x515   : > { %v978_v15 = vpop.f32.mrf.mxu0 }
 0x516   : > { %v984_v16 = vpack.c.bf16 %v978_v15, %v978_v15 }
 0x517   : > { %v1881_v17 = vpop.f32.mrf.mxu0 }
 0x518   : > { %986 = vst.msk [vmem:[#allocation4] sm:$0xf] %vm985_vm5, %v984_v16 }
 0x519   : > { %v981_v18 = vpop.f32.mrf.mxu0 }
 0x51a   : > { %v1798_v18 = vld [vmem:[%s2693_s16] ss:$0 sm:$0xff] }
 0x51b   : > { %v1882_v19 = vpop.f32.mrf.mxu0 }
 0x58a   : > { %v1100_v20 = vpop.f32.mrf.mxu0 }
 0x58b   : > { %v1808_v21 = vpack.c.bf16 %v1100_v20, %v1100_v20 }
 0x58c   : > { %v1893_v22 = vpop.f32.mrf.mxu0 }
 0x58d   : > { %1110 = vrot.lane.b32.xlu1 %v1808_v21, %s2261_s30  ;;  %s597_s30 = scalar_lea.vmem [#allocation11], %s1753_s28  ;;  %s2169_s28 = sshll.u32 %s2264_s21, 4  ;;  %s2170_s28 = int_to_ptr.vmem [resolvable:$false] %s2169_s28 }
 0x58e   : > { %v1103_v23 = vpop.f32.mrf.mxu0  ;;  %s2171_s18 = scalar_lea.vmem %s2170_s28, 256 }
 0x590   : > { %v1894_v24 = vpop.f32.mrf.mxu0 }
 0x592   : > { %v1227_v25 = vpop.f32.mrf.mxu0 }
 0x593   : > { %v1809_v26 = vpack.c.bf16 %v1227_v25, %v1227_v25 }
 0x594   : > { %v1905_v27 = vpop.f32.mrf.mxu0 }
 0x595   : > { %1237 = vrot.lane.b32.xlu0 %v1809_v26, %s2262_s0  ;;  %s1639_s0 = sshll.u32 %s597_s30, 4  ;;  %s2632_s0 = int_to_ptr.vmem [resolvable:$true] %s1639_s0 }
 0x596   : > { %v1230_v28 = vpop.f32.mrf.mxu0  ;;  %s2165_s19 = scalar_lea.vmem %s2632_s0, 128  ;;  %p2172_p3 = scmp.lt.s32.totalorder %s2632_s0, %s2170_s28 }
 0x597   : > { %p2166_p10 = scmp.ne.s32.totalorder %s2632_s0, %s2165_s19  ;;  %p2173_p6 = scmp.lt.s32.totalorder %s2171_s18, %s2165_s19 }
 0x598   : > { %v1906_v29 = vpop.f32.mrf.mxu0 }
 0x599   : > { %p2167_p11 = pnand %p2166_p10, %p2395_p4  ;;  %p2174_p7 = por %p2173_p6, %p2172_p3 }
 0x59b   : > { %p2168_p13 = pneg %p2167_p11 }
 0x59d   : > { %p2175_p9 = pnand %p2174_p7, %p2168_p13 }
 0x5bf   : > { %v1354_v32 = vpop.f32.mrf.mxu0 }
 0x5c0   : > { %v1810_v33 = vpack.c.bf16 %v1354_v32, %v1354_v32 }
 0x5c1   : > { %v1917_v34 = vpop.f32.mrf.mxu0 }
 0x5c2   : > { %1364 = vrot.lane.b32.xlu1 %v1810_v33, %s2263_s24 }
 0x5c3   : > { %v1357_v35 = vpop.f32.mrf.mxu0 }
 0x5c5   : > { %v1918_v36 = vpop.f32.mrf.mxu0 }
 0x5ff   : > { %v1111_v37 = vpop.permute.xlu1 %1110 }
 0x600   : > { %1114 = vst.msk [vmem:[#allocation4] sm:$0xf] %vm1113_vm6, %v1111_v37 }
 0x607   : > { %v1238_v38 = vpop.permute.xlu0 %1237 }
 0x608   : > { %1241 = vst.msk [vmem:[#allocation4] sm:$0xf] %vm1240_vm7, %v1238_v38 }
 0x634   : > { %v1365_v39 = vpop.permute.xlu1 %1364 }
 0x635   : > { %1368 = vst.msk [vmem:[#allocation4] sm:$0xf] %vm1367_vm8, %v1365_v39 }
 0x63c   : > { %v1369_v40 = vld [vmem:[#allocation4] sm:$0xf] }
 0x63d   : > { %1924 = vmatmul.mubr.msk.bf16.vlgmr.msra.gmra.mxu1 %vm610_vm0, %v1369_v40 }
 0x63e   : > { %1943 = vmatprep.mubr.msk.bf16.mxu1 %vm2257_vm1, %v2256_v14  ;;  %1936 = vmatpush3.bf16.msra.mxu1 %v2059_v2 }
 0x63f   : > { %1937 = vmatprep.subr.bf16.mxu1 %v2256_v14 }
 0x642   : > { %1938 = vmatpush3.bf16.msra.mxu1 %v2060_v3 }
 0x643   : > { %1939 = vmatprep.subr.bf16.mxu1 %v2256_v14 }
 0x646   : > { %1940 = vmatpush3.bf16.msra.mxu1 %v2061_v4 }
 0x647   : > { %1941 = vmatprep.subr.bf16.mxu1 %v2256_v14 }
 0x64a   : > { %1942 = vmatpush3.bf16.msra.mxu1 %v2062_v5 }
 0x6fd   : > { %v1430_v42 = vpop.f32.mrf.mxu1 }
 0x6fe   : > { %v1431_v43 = vadd.f32 %v1788_v41, %v1430_v42 }
 0x6ff   : > { %v1925_v44 = vpop.f32.mrf.mxu1 }
 0x700   : > { %v2589_v45 = vadd.f32 %v1431_v43, %v2467_v0 }
 0x701   : > { %v1433_v46 = vpop.f32.mrf.mxu1 }
 0x702   : > { %v1439_v47 = vsel %vm610_vm0, %v2589_v45, 0.0 }
 0x703   : > { %1440 = vadd.xlane.f32.xlu0 %v1439_v47  ;;  %v1926_v48 = vpop.f32.mrf.mxu1 }
 0x78c   : > { %v1441_v49 = vpop.xlane.xlu0 %1440 }
 0x78d   : > { %v1442_v50 = vmul.f32 0.03125, %v1441_v49 }
 0x78f   : > { %v1443_v51 = vsub.f32 %v2589_v45, %v1442_v50 }
 0x791   : > { %v1444_v52 = vmul.f32 %v1443_v51, %v1443_v51 }
 0x793   : > { %v1445_v53 = vsel %vm610_vm0, %v1444_v52, 0.0 }
 0x794   : > { %1446 = vadd.xlane.f32.xlu1 %v1445_v53 }
 0x81d   : > { %v1447_v0 = vpop.xlane.xlu1 %1446 }
 0x81e   : > { %v1448_v56 = vmul.f32 0.03125, %v1447_v0 }
 0x820   : > { %v1449_v57 = vadd.f32 1e-05, %v1448_v56 }
 0x822   : > { %2083 = vrsqrt.f32 %v1449_v57 }
 0x82f   : > { %v2084_v58 = vpop.eup %2083 }
 0x830   : > { %v1451_v60 = vmul.f32 %v2084_v58, %v1443_v51 }
 0x832   : > { %v1458_v62 = vmul.f32 %v1792_v59, %v1451_v60 }
 0x834   : > { %v1465_v63 = vadd.f32 %v1793_v61, %v1458_v62 }
 0x836   : > { %v1466_v1 = vpack.c.bf16 %v1465_v63, %v1465_v63 }
 0x838   : > { %1932 = vmatmul.mubr.msk.bf16.vlgmr.msra.gmra.mxu0 %vm610_vm0, %v1466_v1 }
 0x8f8   : > { %v1527_v7 = vpop.f32.mrf.mxu0 }
 0x8f9   : > { %v1528_v8 = vadd.f32 %v1794_v6, %v1527_v7 }
 0x8fa   : > { %v1933_v9 = vpop.f32.mrf.mxu0 }
 0x8fb   : > { %v1534_v10 = vmul.f32 0.70710677, %v1528_v8  ;;  %v1533_v14 = vmul.f32 0.5, %v1528_v8 }
 0x8fc   : > { %v1530_v11 = vpop.f32.mrf.mxu0 }
 0x8fd   : > { %2085 = verf.f32 %v1534_v10 }
 0x8fe   : > { %v1934_v12 = vpop.f32.mrf.mxu0 }
 0x90a   : > { %v2086_v13 = vpop.eup %2085 }
 0x90b   : > { %v1536_v15 = vadd.f32 1.0, %v2086_v13 }
 0x90d   : > { %v1537_v16 = vmul.f32 %v1536_v15, %v1533_v14 }
 0x90f   : > { %v1538_v17 = vpack.c.bf16 %v1537_v16, %v1537_v16 }
 0x911   : > { %1944 = vmatmul.mubr.msk.bf16.vlgmr.msra.gmra.mxu1 %vm1578_vm9, %v1538_v17 }
 0x9d1   : > { %v1616_v19 = vpop.f32.mrf.mxu1 }
 0x9d2   : > { %v1617_v20 = vadd.f32 %v1798_v18, %v1616_v19 }
 0x9d3   : > { %v1945_v21 = vpop.f32.mrf.mxu1 }
 0x9d4   : > { %v1622_v22 = vadd.f32 %v1617_v20, %v2589_v45 }
 0x9d5   : > { %v1619_v23 = vpop.f32.mrf.mxu1 }
 0x9d6   : > { %1623 = vst.msk [vmem:[%s597_s30] sm:$0xff] %vm610_vm0, %v1622_v22 }
 0x9d7   : > { %v1946_v24 = vpop.f32.mrf.mxu1 }
 0x9d8   : > { %2178 = shalt.err (!%p2175_p9)
}
 0x9d9   : > { %s2179_s22 = scalar_lea.hbm %s2630_s20, 128  ;;  %s2183_s30 = scalar_lea.hbm %s2694_s17, 256 }
 0x9da   : > { %p2180_p12 = scmp.ne.s32.totalorder %s2630_s20, %s2179_s22  ;;  %p2184_p2 = scmp.lt.s32.totalorder %s2630_s20, %s2694_s17 }
 0x9db   : > { %p2185_p5 = scmp.lt.s32.totalorder %s2183_s30, %s2179_s22 }
 0x9dc   : > { %p2181_p1 = pnand %p2180_p12, %p2395_p4 }
 0x9dd   : > { %p2186_p0 = por %p2185_p5, %p2184_p2 }
 0x9de   : > { %p2182_p8 = pneg %p2181_p1 }
 0x9e0   : > { %p2187_p10 = pnand %p2186_p0, %p2182_p8 }
 0x9e2   : > { %2190 = shalt.err (!%p2187_p10)
}
 0x9e3   : > { %1959 = dma.vmem_to_hbm [thread:$0]  (%p2395_p4), %s2632_s0, 128, %s2630_s20, %s1625_s27  }
 0x9e4 PF: > { %s2718_s19 = sld [smem:[#allocation18_spill]] }
 0x9e5   : > { %s2719_s21 = sld [smem:[#allocation15_spill]] }
 0x9e6   : > { %s2720_s28 = sld [smem:[#allocation20_spill]] }
 0x9ea   : > { %p1981_p11 = scmp.ge.s32.totalorder %s2718_s19, 2 }
 0x9eb   : > { %s1651_s18 = sand.u32 1, %s2719_s21  }
 0x9ec   : > { %p2721_p13 = scmp.ne.s32.totalorder %s2720_s28, 0  ;;  %s1652_s29 = scalar_lea.sflag [#allocation7], %s1651_s18 }
 0x9ee   : > { %p1972_p3 = pnand %p1981_p11, %p2721_p13 }
 0x9f0   : > { %p1973_p6 = pneg %p1972_p3 }
 0x9f2   : > { %2224 = dma.done.wait (%p1973_p6), %s1652_s29, 128  }
 0x9f3   : > { %2226 = vsyncadd (%p1973_p6), %s1652_s29, 4294967168  ;;  %s32_s29 = sadd.s32 1, %s2718_s19   ;;  %s2722_s1 = sld [smem:[#allocation16_spill]] }
 0x9f4   : > { %p29_p7 = scmp.ge.s32.totalorder %s32_s29, 4   ;;  %s2723_s26 = sld [smem:[#allocation21_spill]] }
 0x9f5   : > { %s2724_s27 = sld [smem:[#allocation17_spill]]  ;;  %s2726_s24 = smov %s2233_s25 }
 0x9f6   : > { %s2725_s28 = sld [smem:[#allocation19_spill]]  ;;  %31 = sbr.rel (!%p29_p7) target bundleno = 9 (0x9), region = 141 }
 0x9f9   : > { %s2727_s25 = smov %s2722_s1 }
 0x9fb   :  { %1657 = vsyncpa [#allocation6], 1 }
 0x9fc   :  { %1659 = vsyncpa [#allocation6 + $0x1], 1 }
 0x9fd   :  { %1660 = vsyncpa [#allocation9], 1 }
 0x9fe   :  { %1661 = vsyncpa [#allocation7], 1 }
 0x9ff   :  { %1663 = vsyncpa [#allocation7 + $0x1], 1 }

// kernel: tpu_custom_call.1
= control target key start
LH: loop header
LB: loop body
LE: loop exit
PB: predicated region body
PF: predicated region fallthrough
CT: control target
= control target key end

     0   :  { %s2675_s0 = inlined_call_operand.vmem [shape: f32[2,8,32], index: 0, kind: input, shape index: {}]   ;;  %s2676_s1 = inlined_call_operand.vmem [shape: f32[1,32], index: 1, kind: input, shape index: {}]   ;;  %s2677_s2 = inlined_call_operand.vmem [shape: f32[1,32], index: 2, kind: input, shape index: {}]   ;;  %s2678_s3 = inlined_call_operand.vmem [shape: bf16[32,32], index: 3, kind: input, shape index: {}]   ;;  %s2679_s4 = inlined_call_operand.vmem [shape: f32[1,32], index: 4, kind: input, shape index: {}]   ;;  %s2680_s5 = inlined_call_operand.vmem [shape: bf16[32,32], index: 5, kind: input, shape index: {}]   ;;  %s2681_s6 = inlined_call_operand.vmem [shape: f32[1,32], index: 6, kind: input, shape index: {}]   ;;  %s2682_s7 = inlined_call_operand.hbm [shape: bf16[32,32], index: 7, kind: input, shape index: {}]   ;;  %s2683_s8 = inlined_call_operand.vmem [shape: f32[1,32], index: 8, kind: input, shape index: {}]   ;;  %s2684_s9 = inlined_call_operand.hbm [shape: bf16[32,32], index: 9, kind: input, shape index: {}]   ;;  %s2685_s10 = inlined_call_operand.vmem [shape: f32[1,32], index: 10, kind: input, shape index: {}]   ;;  %s2686_s11 = inlined_call_operand.vmem [shape: f32[1,32], index: 11, kind: input, shape index: {}]   ;;  %s2687_s12 = inlined_call_operand.vmem [shape: f32[1,32], index: 12, kind: input, shape index: {}]   ;;  %s2688_s13 = inlined_call_operand.hbm [shape: bf16[32,64], index: 13, kind: input, shape index: {}]   ;;  %s2689_s14 = inlined_call_operand.vmem [shape: f32[1,64], index: 14, kind: input, shape index: {}]   ;;  %s2690_s15 = inlined_call_operand.vmem [shape: bf16[64,32], index: 15, kind: input, shape index: {}]   ;;  %s2691_s16 = inlined_call_operand.vmem [shape: f32[1,32], index: 16, kind: input, shape index: {}]   ;;  %s2692_s17 = inlined_call_operand.hbm [shape: f32[2,8,32], index: 17, kind: output, shape index: {}]  }
   0x1   :  { %2700 = sst [smem:[#allocation22_spill]] %s2675_s0 }
   0x2   :  { %2701 = sst [smem:[#allocation23_spill]] %s2676_s1 }
   0x3   :  { %22 = vsyncpa [#allocation6], 0 }
   0x4   :  { %23 = vsyncpa [#allocation9], 0 }
   0x5   :  { %24 = vsyncpa [#allocation7], 0 }
   0x6   :  { %26 = vsyncpa [#allocation7 + $0x1], 0  ;;  %s2353_s24 = smov 0   ;;  %s2355_s25 = smov 0  }
   0x7   :  { %s2357_s26 = smov 0   ;;  %s2359_s27 = smov 0  }
   0x8   :  { %s2361_s28 = smov 0   ;;  %s2363_s29 = smov 0  }
   0x9 LB: > { %2702 = sst [smem:[#allocation15_spill]] %s2227_s24  ;;  %s1740_s0 = sadd.s32 4294967295, %s2247_s29   ;;  %s2247_s29 = sphi %s2363_s29, %s32_s29   ;;  %s2243_s28 = sphi %s2361_s28, %s2723_s28   ;;  %s2239_s27 = sphi %s2359_s27, %s2722_s27   ;;  %s2235_s26 = sphi %s2357_s26, %s2721_s26   ;;  %s2231_s25 = sphi %s2355_s25, %s2725_s25   ;;  %s2227_s24 = sphi %s2353_s24, %s2724_s24  }
   0xa   : > { %2703 = sst [smem:[#allocation16_spill]] %s2235_s26  ;;  %s1741_s30 = sadd.s32 4294967294, %s2247_s29  }
   0xb   : > { %2704 = sst [smem:[#allocation17_spill]] %s2243_s28  ;;  %s44_s18 = sadd.s32 1, %s2243_s28 }
   0xc   : > { %2705 = sst [smem:[#allocation18_spill]] %s2247_s29  ;;  %s415_s19 = sadd.s32 1, %s2235_s26 }
   0xd   : > { %p46_p0 = scmp.ge.s32.totalorder %s44_s18, 2  ;;  %p425_p1 = scmp.ne.s32.totalorder %s2235_s26, %s2231_s25 }
   0xe   : > { %p426_p2 = scmp.eq.s32.totalorder %s1740_s0, 1  ;;  %p431_p3 = scmp.ne.s32.totalorder %s2231_s25, %s2227_s24 }
   0xf   : > { %s2727_s18 = smov (%p46_p0, %s44_s18), 0  ;;  %p432_p5 = scmp.eq.s32.totalorder %s1741_s30, 1 }
  0x10   : > { %2706 = sst [smem:[#allocation19_spill]] %s2727_s18  ;;  %p2393_p4 = por %p426_p2, %p425_p1 }
  0x11   : > { %s410_s20 = ssub.s32 %s2243_s28, %s2727_s18  ;;  %p1742_p6 = scmp.ge.s32.totalorder %s2247_s29, 1 }
  0x12   : > { %p413_p7 = scmp.eq.s32.totalorder %s410_s20, 0  ;;  %p2400_p8 = por %p432_p5, %p431_p3 }
  0x13   : > { %p439_p9 = scmp.lt.s32.totalorder %s2247_s29, 3  ;;  %p2412_p11 = scmp.eq.s32.totalorder %s1740_s0, 0 }
  0x14   : > { %s2708_s21 = scalar_select %p2400_p8, 1, 0 }
  0x15   : > { %s2406_s22 = scalar_select %p413_p7, %s2235_s26, %s415_s19  }
  0x16   : > { %2709 = sst [smem:[#allocation20_spill]] %s2708_s21  ;;  %p2408_p10 = pnand %p1742_p6, %p439_p9 }
  0x17   : > { %2710 = sst [smem:[#allocation21_spill]] %s2406_s22  ;;  %s2249_s30 = smov [#allocation8]  }
  0x18   : > { %p1959_p12 = pneg %p2408_p10  ;;  %s485_s20 = sshll.u32 %s2249_s30, 4  ;;  %s486_s20 = int_to_ptr.vmem [resolvable:$true] %s485_s20 }
  0x19   : > { %s2250_s19 = smov [#allocation5]   ;;  %s2096_s0 = scalar_lea.vmem %s486_s20, 256 }
  0x1a   : > { %p2420_p13 = pnand %p2412_p11, %p1959_p12  ;;  %s469_s28 = sshll.u32 %s2250_s19, 4  ;;  %s470_s28 = int_to_ptr.vmem [resolvable:$true] %s469_s28 }
  0x1b   : > { %p2097_p1 = scmp.ne.s32.totalorder %s486_s20, %s2096_s0  ;;  %p2104_p5 = scmp.lt.s32.totalorder %s486_s20, %s486_s20 }
  0x1c   : > { %p2087_p0 = pneg %p2420_p13  ;;  %p2105_p6 = scmp.lt.s32.totalorder %s2096_s0, %s2096_s0 }
  0x1e   : > { %p2099_p2 = pnand %p2097_p1, %p2087_p0  ;;  %p2106_p7 = por %p2105_p6, %p2104_p5 }
  0x20   : > { %p2100_p3 = pneg %p2099_p2 }
  0x22   : > { %p2107_p9 = pnand %p2106_p7, %p2100_p3 }
  0x24   : > { %2110 = shalt.err (!%p2107_p9)
}
  0x25   : > { %s2251_s30 = smov 64   ;;  %s2252_s22 = smov 4  }
  0x26   : > { %1965 = dma.hbm_to_vmem [thread:$0]  (!%p2420_p13), %s2684_s9, 256, %s486_s20, [#allocation9], %s2251_s30, %s2251_s30, %s2252_s22  }
  0x27   : > { %s2122_s21 = scalar_lea.vmem %s470_s28, 256  ;;  %p2130_p8 = scmp.lt.s32.totalorder %s470_s28, %s470_s28 }
  0x28   : > { %p2123_p12 = scmp.ne.s32.totalorder %s470_s28, %s2122_s21  ;;  %p2131_p5 = scmp.lt.s32.totalorder %s2122_s21, %s2122_s21 }
  0x2a   : > { %p2125_p1 = pnand %p2123_p12, %p2087_p0  ;;  %p2132_p3 = por %p2131_p5, %p2130_p8 }
  0x2c   : > { %p2126_p2 = pneg %p2125_p1 }
  0x2e   : > { %p2133_p6 = pnand %p2132_p3, %p2126_p2 }
  0x30   : > { %2136 = shalt.err (!%p2133_p6)
}
  0x31   : > { %1962 = dma.hbm_to_vmem [thread:$0]  (!%p2420_p13), %s2682_s7, 256, %s470_s28, [#allocation6], %s2251_s30, %s2251_s30, %s2252_s22  }
  0x32   : > { %s2253_s26 = smov [#allocation10]  }
  0x33   : > { %s507_s20 = sshll.u32 %s2253_s26, 4  ;;  %s508_s20 = int_to_ptr.vmem [resolvable:$true] %s507_s20 }
  0x34   : > { %s2148_s19 = scalar_lea.vmem %s508_s20, 256  ;;  %p2156_p1 = scmp.lt.s32.totalorder %s508_s20, %s508_s20 }
  0x35   : > { %p2149_p7 = scmp.ne.s32.totalorder %s508_s20, %s2148_s19  ;;  %p2157_p8 = scmp.lt.s32.totalorder %s2148_s19, %s2148_s19 }
  0x37   : > { %p2151_p9 = pnand %p2149_p7, %p2087_p0  ;;  %p2158_p2 = por %p2157_p8, %p2156_p1 }
  0x39   : > { %p2152_p12 = pneg %p2151_p9 }
  0x3b   : > { %p2159_p5 = pnand %p2158_p2, %p2152_p12 }
  0x3d   : > { %2162 = shalt.err (!%p2159_p5)
}
  0x3e   : > { %1968 = dma.hbm_to_vmem [thread:$0]  (!%p2420_p13), %s2688_s13, 256, %s508_s20, [#allocation9], %s2251_s30, %s2251_s30, %s2252_s22  }
  0x3f   : > { %539 = sbr.rel (%p2408_p10) target bundleno = 2532 (0x9e4), region = 88 }
  0x44   : > { %2214 = dma.done.wait (%p2412_p11), [#allocation6], 256  }
  0x45   : > { %2216 = vsyncadd (%p2412_p11), [#allocation6], 4294967040 }
  0x46   : > { %2218 = dma.done.wait (%p2412_p11), [#allocation9], 512  }
  0x47   : > { %2220 = vsyncadd (%p2412_p11), [#allocation9], 4294966784  ;;  %p598_p0 = scmp.lt.s32.totalorder %s2239_s27, 1  ;;  %s2714_s30 = sld [smem:[#allocation22_spill]]  ;;  %vm610_vm0 = vcmask 261120   ;;  %v2041_v12 = vld [vmem:[%s2680_s5 + $0x8] sm:$0xff]  }
  0x48   : > { %v2042_v13 = vld [vmem:[#allocation5 + $0x8] sm:$0xff]   ;;  %v2254_v14 = vmov 0.0   ;;  %v2043_v15 = vld [vmem:[%s2680_s5] sm:$0xff]   ;;  %v2044_v16 = vld [vmem:[#allocation5] sm:$0xff]   ;;  %vm2255_vm1 = vmmov 0   ;;  %vm770_vm2 = vcmask 257024  }
  0x49   : > { %s599_s28 = scalar_select %p598_p0, %s2239_s27, 1  ;;  %1845 = vmatprep.subr.bf16.mxu0 %v2254_v14  ;;  %1853 = vmatprep.subr.bf16.mxu1 %v2254_v14  ;;  %v1754_v26 = vld [vmem:[%s2677_s2] ss:$0 sm:$0xff]  ;;  %v2045_v31 = vld [vmem:[%s2678_s3 + $0x8] sm:$0xff]   ;;  %vm878_vm3 = vcmask 64512   ;;  %vm940_vm4 = vcmask 1043456  }
  0x4a   : > { %1846 = vmatpush3.bf16.msra.mxu0 %v2041_v12  ;;  %1854 = vmatpush3.bf16.msra.mxu1 %v2042_v13  ;;  %v2046_v34 = vld [vmem:[%s2678_s3] sm:$0xff]   ;;  %s2257_s22 = smov 112   ;;  %s2258_s23 = smov 104   ;;  %vm985_vm5 = vcmask 60416   ;;  %vm1113_vm6 = vcmask 126016   ;;  %vm1240_vm7 = vcmask 191616  }
  0x4b   : > { %s1752_s18 = sshll.u32 %s599_s28, 3  ;;  %1847 = vmatprep.subr.bf16.mxu0 %v2254_v14  ;;  %1855 = vmatprep.subr.bf16.mxu1 %v2254_v14  ;;  %s2715_s28 = sld [smem:[#allocation23_spill]]  ;;  %v1755_v37 = vld [vmem:[%s2681_s6] ss:$0 sm:$0xff]  ;;  %vm1367_vm8 = vcmask 257216   ;;  %vm1578_vm9 = vcmask 523264  }
  0x4c   : > { %1849 = vmatprep.mubr.msk.bf16.mxu0 %vm2255_vm1, %v2254_v14  ;;  %1857 = vmatprep.mubr.msk.bf16.mxu1 %vm2255_vm1, %v2254_v14  ;;  %v1759_v38 = vld [vmem:[%s2683_s8] ss:$0 sm:$0xff]  ;;  %s2261_s24 = smov 24   ;;  %s595_s29 = sand.u32 1, %s2231_s25  }
  0x4d   : > { %s601_s0 = scalar_lea.vmem %s2714_s30, %s1752_s18  ;;  %v1765_v51 = vld [vmem:[%s2679_s4] ss:$0 sm:$0xff]  ;;  %s2256_s18 = smov 120  }
  0x4e   : > { %v2465_v0 = vld [vmem:[%s601_s0] sm:$0xff]  ;;  %1848 = vmatpush3.bf16.msra.mxu0 %v2043_v15  ;;  %1856 = vmatpush3.bf16.msra.mxu1 %v2044_v16  ;;  %s2259_s30 = smov 8   ;;  %s2260_s0 = smov 16  }
  0x4f   : > { %v611_v1 = vsel %vm610_vm0, %v2465_v0, 0.0  ;;  %1861 = vmatprep.subr.bf16.mxu0 %v2254_v14  ;;  %1869 = vmatprep.subr.bf16.mxu1 %v2254_v14  ;;  %s2262_s21 = smov [#allocation11]  }
  0x50   : > { %612 = vadd.xlane.f32.xlu0 %v611_v1 }
  0x51   : > { %v1753_v24 = vld [vmem:[%s2715_s28] ss:$0 sm:$0xff]  ;;  %s1751_s28 = sshll.u32 %s595_s29, 3 }
  0x54   : > { %781 = vadd.xlane.f32.xlu0 %v611_v1 }
  0xd9   : > { %v613_v2 = vpop.xlane.xlu0 %612 }
  0xda   : > { %v615_v3 = vmul.f32 0.03125, %v613_v2 }
  0xdc   : > { %v616_v4 = vsub.f32 %v2465_v0, %v615_v3 }
  0xdd   : > { %v782_v5 = vpop.xlane.xlu0 %781 }
  0xde   : > { %v784_v6 = vmul.f32 0.03125, %v782_v5  ;;  %v617_v7 = vmul.f32 %v616_v4, %v616_v4 }
  0xe0   : > { %v785_v8 = vsub.f32 %v2465_v0, %v784_v6  ;;  %v618_v9 = vsel %vm610_vm0, %v617_v7, 0.0 }
  0xe1   : > { %619 = vadd.xlane.f32.xlu1 %v618_v9 }
  0xe2   : > { %v786_v10 = vmul.f32 %v785_v8, %v785_v8 }
  0xe4   : > { %v787_v11 = vsel %vm610_vm0, %v786_v10, 0.0 }
  0xe5   : > { %788 = vadd.xlane.f32.xlu1 %v787_v11 }
 0x16a   : > { %v620_v17 = vpop.xlane.xlu1 %619 }
 0x16b   : > { %v621_v18 = vmul.f32 0.03125, %v620_v17 }
 0x16d   : > { %v622_v19 = vadd.f32 1e-05, %v621_v18 }
 0x16e   : > { %v789_v20 = vpop.xlane.xlu1 %788 }
 0x16f   : > { %2061 = vrsqrt.f32 %v622_v19  ;;  %v790_v21 = vmul.f32 0.03125, %v789_v20 }
 0x171   : > { %v791_v22 = vadd.f32 1e-05, %v790_v21 }
 0x173   : > { %2063 = vrsqrt.f32 %v791_v22 }
 0x17c   : > { %v2062_v23 = vpop.eup %2061 }
 0x17d   : > { %v624_v25 = vmul.f32 %v2062_v23, %v616_v4 }
 0x17f   : > { %v631_v27 = vmul.f32 %v1753_v24, %v624_v25 }
 0x180   : > { %v2064_v28 = vpop.eup %2063 }
 0x181   : > { %v793_v29 = vmul.f32 %v2064_v28, %v785_v8  ;;  %v638_v30 = vadd.f32 %v1754_v26, %v631_v27 }
 0x183   : > { %v639_v32 = vpack.c.bf16 %v638_v30, %v638_v30  ;;  %v800_v33 = vmul.f32 %v1753_v24, %v793_v29 }
 0x185   : > { %1850 = vmatmul.mubr.msk.bf16.vlgmr.msra.gmra.mxu0 %vm610_vm0, %v639_v32  ;;  %1858 = vmatmul.mubr.msk.bf16.vlgmr.msra.gmra.mxu1 %vm610_vm0, %v639_v32  ;;  %v807_v35 = vadd.f32 %v1754_v26, %v800_v33 }
 0x186   : > { %1862 = vmatpush3.bf16.msra.mxu0 %v2045_v31  ;;  %1865 = vmatprep.mubr.msk.bf16.mxu0 %vm2255_vm1, %v2254_v14 }
 0x187   : > { %1863 = vmatprep.subr.bf16.mxu0 %v2254_v14  ;;  %1871 = vmatprep.mubr.msk.bf16.mxu1 %vm2255_vm1, %v2254_v14  ;;  %v808_v36 = vpack.c.bf16 %v807_v35, %v807_v35 }
 0x18a   : > { %1864 = vmatpush3.bf16.msra.mxu0 %v2046_v34 }
 0x18b   : > { %1875 = vmatprep.subr.bf16.mxu0 %v2254_v14 }
 0x18d   : > { %1866 = vmatmul.mubr.msk.bf16.vlgmr.msra.gmra.mxu0 %vm610_vm0, %v808_v36 }
 0x18e   : > { %1877 = vmatprep.mubr.msk.bf16.mxu0 %vm2255_vm1, %v2254_v14 }
 0x245   : > { %v700_v39 = vpop.f32.mrf.mxu0  ;;  %v763_v40 = vpop.f32.mrf.mxu1 }
 0x246   : > { %v701_v41 = vadd.f32 %v1755_v37, %v700_v39  ;;  %v764_v42 = vadd.f32 %v1759_v38, %v763_v40 }
 0x247   : > { %v1851_v43 = vpop.f32.mrf.mxu0  ;;  %v1859_v44 = vpop.f32.mrf.mxu1 }
 0x248   : > { %v769_v45 = vpack.c.bf16 %v701_v41, %v701_v41  ;;  %v772_v46 = vpack.c.bf16 %v764_v42, %v764_v42 }
 0x249   : > { %v703_v47 = vpop.f32.mrf.mxu0  ;;  %v766_v48 = vpop.f32.mrf.mxu1 }
 0x24a   : > { %771 = vst.msk [vmem:[#allocation2] sm:$0xf] %vm770_vm2, %v769_v45  ;;  %773 = vst.msk [vmem:[#allocation3] sm:$0xf] %vm770_vm2, %v772_v46 }
 0x24b   : > { %v1852_v49 = vpop.f32.mrf.mxu0  ;;  %v1860_v50 = vpop.f32.mrf.mxu1 }
 0x24d   : > { %v869_v52 = vpop.f32.mrf.mxu0 }
 0x24e   : > { %v870_v53 = vadd.f32 %v1765_v51, %v869_v52 }
 0x24f   : > { %v1867_v54 = vpop.f32.mrf.mxu0 }
 0x250   : > { %v875_v55 = vpack.c.bf16 %v870_v53, %v870_v53 }
 0x251   : > { %v872_v56 = vpop.f32.mrf.mxu0  ;;  %v876_v57 = vld [vmem:[#allocation2] sm:$0xf]  ;;  %v877_v58 = vld [vmem:[#allocation3] sm:$0xf] }
 0x252   : > { %990 = vrot.lane.b32.xlu1 %v875_v55, %s2256_s18  ;;  %v883_v59 = vsel %vm878_vm3, %v876_v57, 0  ;;  %v942_v60 = vsel %vm940_vm4, %v877_v58, 0  ;;  %v2047_v61 = vld [vmem:[#allocation2] ss:$0 sps:$4 sm:$0xff]   ;;  %v2050_v47 = vld [vmem:[#allocation3] ss:$0 sps:$4 sm:$0xff]  }
 0x253   : > { %v1868_v62 = vpop.f32.mrf.mxu0  ;;  %1870 = vmatpush3.bf16.xpose.msra.mxu1 %v883_v59  ;;  %1876 = vmatpush3.bf16.msra.mxu0 %v942_v60  ;;  %v2048_v63 = vld [vmem:[#allocation2] ss:$0 sps:$4 sm:$0xff]   ;;  %v2051_v51 = vld [vmem:[#allocation3] ss:$0 sps:$4 sm:$0xff]  }
 0x254   : > { %995 = vrot.lane.b32.xlu0 %v2047_v61, %s2256_s18  ;;  %1881 = vmatprep.subr.bf16.mxu1 %v2254_v14  ;;  %v2049_v1 = vld [vmem:[#allocation2] ss:$0 sps:$4 sm:$0xff]   ;;  %v2052_v58 = vld [vmem:[#allocation3] ss:$0 sps:$4 sm:$0xff]  }
 0x255   : > { %1887 = vmatprep.subr.bf16.mxu0 %v2254_v14 }
 0x256   : > { %1122 = vrot.lane.b32.xlu1 %v2048_v63, %s2257_s22 }
 0x258   : > { %1249 = vrot.lane.b32.xlu0 %v2049_v1, %s2258_s23 }
 0x25a   : > { %1117 = vrot.lane.b32.xlu1 %v875_v55, %s2257_s22  ;;  %1872 = vmatmul.mubr.msk.bf16.vlgmr.msra.gmra.mxu1 %vm878_vm3, %v875_v55 }
 0x25b   : > { %1883 = vmatprep.mubr.msk.bf16.mxu1 %vm2255_vm1, %v2254_v14 }
 0x25e   : > { %1244 = vrot.lane.b32.xlu1 %v875_v55, %s2258_s23 }
 0x2c4   : > { %v991_v2 = vpop.permute.xlu1 %990 }
 0x2c6   : > { %v996_v3 = vpop.permute.xlu0 %995 }
 0x2c7   : > { %v1001_v4 = vsel %vm878_vm3, %v996_v3, 0 }
 0x2c8   : > { %1882 = vmatpush3.bf16.xpose.msra.mxu1 %v1001_v4  ;;  %v1123_v5 = vpop.permute.xlu1 %1122 }
 0x2c9   : > { %1893 = vmatprep.subr.bf16.mxu1 %v2254_v14  ;;  %v1128_v6 = vsel %vm878_vm3, %v1123_v5, 0 }
 0x2ca   : > { %v1250_v7 = vpop.permute.xlu0 %1249 }
 0x2cb   : > { %v1255_v9 = vsel %vm878_vm3, %v1250_v7, 0 }
 0x2cc   : > { %v1118_v8 = vpop.permute.xlu1 %1117 }
 0x2cf   : > { %1884 = vmatmul.mubr.msk.bf16.vlgmr.msra.gmra.mxu1 %vm878_vm3, %v991_v2 }
 0x2d0   : > { %1894 = vmatpush3.bf16.xpose.msra.mxu1 %v1128_v6  ;;  %1895 = vmatprep.mubr.msk.bf16.mxu1 %vm2255_vm1, %v2254_v14  ;;  %v1245_v10 = vpop.permute.xlu1 %1244 }
 0x2d1   : > { %1905 = vmatprep.subr.bf16.mxu1 %v2254_v14 }
 0x2d7   : > { %1896 = vmatmul.mubr.msk.bf16.vlgmr.msra.gmra.mxu1 %vm878_vm3, %v1118_v8 }
 0x2d8   : > { %1906 = vmatpush3.bf16.xpose.msra.mxu1 %v1255_v9  ;;  %1907 = vmatprep.mubr.msk.bf16.mxu1 %vm2255_vm1, %v2254_v14 }
 0x2d9   : > { %1917 = vmatprep.subr.bf16.mxu1 %v2254_v14 }
 0x2df   : > { %1908 = vmatmul.mubr.msk.bf16.vlgmr.msra.gmra.mxu1 %vm878_vm3, %v1245_v10 }
 0x2e0   : > { %1921 = vmatprep.mubr.msk.bf16.mxu1 %vm2255_vm1, %v2254_v14 }
 0x31a   : > { %v919_v11 = vpop.f32.mrf.mxu1 }
 0x31b   : > { %v925_v12 = vsel %vm878_vm3, %v919_v11, -inf }
 0x31c   : > { %926 = vmax.xlane.f32.xlu0 %v925_v12  ;;  %v1873_v13 = vpop.f32.mrf.mxu1 }
 0x31e   : > { %v922_v15 = vpop.f32.mrf.mxu1 }
 0x320   : > { %v1874_v16 = vpop.f32.mrf.mxu1 }
 0x38f   : > { %v1037_v17 = vpop.f32.mrf.mxu1 }
 0x390   : > { %v1043_v18 = vsel %vm878_vm3, %v1037_v17, -inf }
 0x391   : > { %1044 = vmax.xlane.f32.xlu1 %v1043_v18  ;;  %v1885_v19 = vpop.f32.mrf.mxu1 }
 0x393   : > { %v1040_v20 = vpop.f32.mrf.mxu1 }
 0x395   : > { %v1886_v21 = vpop.f32.mrf.mxu1 }
 0x397   : > { %v1164_v22 = vpop.f32.mrf.mxu1 }
 0x398   : > { %v1170_v23 = vsel %vm878_vm3, %v1164_v22, -inf }
 0x399   : > { %1171 = vmax.xlane.f32.xlu0 %v1170_v23  ;;  %v1897_v24 = vpop.f32.mrf.mxu1 }
 0x39b   : > { %v1167_v25 = vpop.f32.mrf.mxu1 }
 0x39d   : > { %v1898_v26 = vpop.f32.mrf.mxu1 }
 0x39f   : > { %v1291_v27 = vpop.f32.mrf.mxu1 }
 0x3a0   : > { %v1297_v28 = vsel %vm878_vm3, %v1291_v27, -inf }
 0x3a1   : > { %1298 = vmax.xlane.f32.xlu0 %v1297_v28  ;;  %v1909_v29 = vpop.f32.mrf.mxu1 }
 0x3a3   : > { %v1294_v30 = vpop.f32.mrf.mxu1 }
 0x3a4   : > { %v2053_v30 = vld [vmem:[#allocation8 + $0x8] sm:$0xff]  }
 0x3a5   : > { %v1910_v31 = vpop.f32.mrf.mxu1  ;;  %v927_v32 = vpop.xlane.xlu0 %926  ;;  %1918 = vmatpush3.bf16.msra.mxu1 %v2053_v30 }
 0x3a6   : > { %v928_v33 = vsub.f32 %v919_v11, %v927_v32  ;;  %v2054_v31 = vld [vmem:[#allocation8] sm:$0xff]   ;;  %1919 = vmatprep.subr.bf16.mxu1 %v2254_v14 }
 0x3a8   : > { %v929_v34 = vmul.f32 1.442695, %v928_v33 }
 0x3a9   : > { %1920 = vmatpush3.bf16.msra.mxu1 %v2054_v31 }
 0x3aa   : > { %2065 = vpow2.f32 %v929_v34  ;;  %1933 = vmatprep.subr.bf16.mxu1 %v2254_v14 }
 0x3b7   : > { %v2066_v35 = vpop.eup %2065 }
 0x3b8   : > { %v931_v36 = vsel %vm878_vm3, %v2066_v35, 0.0 }
 0x3b9   : > { %932 = vadd.xlane.f32.xlu0 %v931_v36 }
 0x41a   : > { %v1045_v37 = vpop.xlane.xlu1 %1044 }
 0x41b   : > { %v1046_v38 = vsub.f32 %v1037_v17, %v1045_v37 }
 0x41d   : > { %v1047_v39 = vmul.f32 1.442695, %v1046_v38 }
 0x41f   : > { %2067 = vpow2.f32 %v1047_v39 }
 0x422   : > { %v1172_v40 = vpop.xlane.xlu0 %1171 }
 0x423   : > { %v1173_v41 = vsub.f32 %v1164_v22, %v1172_v40 }
 0x425   : > { %v1174_v42 = vmul.f32 1.442695, %v1173_v41  ;;  %v1786_v41 = vld [vmem:[%s2685_s10] ss:$0 sm:$0xff] }
 0x427   : > { %2069 = vpow2.f32 %v1174_v42 }
 0x42a   : > { %v1299_v48 = vpop.xlane.xlu0 %1298 }
 0x42b   : > { %v1300_v50 = vsub.f32 %v1291_v27, %v1299_v48 }
 0x42c   : > { %v2068_v43 = vpop.eup %2067 }
 0x42d   : > { %v1049_v44 = vsel %vm878_vm3, %v2068_v43, 0.0  ;;  %v1301_v52 = vmul.f32 1.442695, %v1300_v50 }
 0x42e   : > { %1050 = vadd.xlane.f32.xlu1 %v1049_v44 }
 0x434   : > { %v2070_v45 = vpop.eup %2069 }
 0x435   : > { %v1176_v46 = vsel %vm878_vm3, %v2070_v45, 0.0 }
 0x436   : > { %1177 = vadd.xlane.f32.xlu0 %v1176_v46 }
 0x43f   : > { %1185 = vrot.lane.b32.xlu1 %v2050_v47, %s2257_s22 }
 0x442   : > { %v933_v49 = vpop.xlane.xlu0 %932 }
 0x443   : > { %2071 = vrcp.f32 %v933_v49 }
 0x444   : > { %2073 = vpow2.f32 %v1301_v52 }
 0x44c   : > { %1058 = vrot.lane.b32.xlu0 %v2051_v51, %s2256_s18 }
 0x450   : > { %v2072_v53 = vpop.eup %2071 }
 0x451   : > { %v935_v54 = vmul.f32 %v2072_v53, %v2066_v35  ;;  %v2074_v56 = vpop.eup %2073 }
 0x452   : > { %v1303_v57 = vsel %vm878_vm3, %v2074_v56, 0.0 }
 0x453   : > { %v936_v55 = vpack.c.bf16 %v935_v54, %v935_v54  ;;  %v2055_v54 = vld [vmem:[#allocation10 + $0x8] sm:$0xff]  }
 0x455   : > { %1878 = vmatmul.mubr.msk.bf16.vlgmr.msra.gmra.mxu0 %vm878_vm3, %v936_v55  ;;  %v2056_v55 = vld [vmem:[#allocation10] sm:$0xff]  }
 0x456   : > { %1889 = vmatprep.mubr.msk.bf16.mxu0 %vm2255_vm1, %v2254_v14 }
 0x463   : > { %1304 = vadd.xlane.f32.xlu1 %v1303_v57 }
 0x474   : > { %1312 = vrot.lane.b32.xlu1 %v2052_v58, %s2258_s23  ;;  %s1803_s23 = sshll.u32 %s2239_s27, 7  ;;  %s1625_s27 = scalar_lea.sflag [#allocation7], %s595_s29 }
 0x475   : > { %s2628_s20 = scalar_lea.hbm %s2692_s17, %s1803_s23 }
 0x4b7   : > { %v1051_v59 = vpop.xlane.xlu1 %1050 }
 0x4b8   : > { %2075 = vrcp.f32 %v1051_v59  ;;  %v1790_v59 = vld [vmem:[%s2686_s11] ss:$0 sm:$0xff] }
 0x4bb   : > { %v1186_v2 = vpop.permute.xlu1 %1185 }
 0x4bc   : > { %v1191_v4 = vsel %vm940_vm4, %v1186_v2, 0  ;;  %v2057_v2 = vld [vmem:[%s2690_s15 + $0x18] sm:$0xff]  }
 0x4bf   : > { %v1178_v60 = vpop.xlane.xlu0 %1177 }
 0x4c0   : > { %2077 = vrcp.f32 %v1178_v60 }
 0x4c3   : > { %v1059_v61 = vpop.permute.xlu0 %1058 }
 0x4c4   : > { %v1064_v62 = vsel %vm940_vm4, %v1059_v61, 0  ;;  %v1791_v61 = vld [vmem:[%s2687_s12] ss:$0 sm:$0xff] }
 0x4c5   : > { %v2076_v63 = vpop.eup %2075  ;;  %1888 = vmatpush3.bf16.msra.mxu0 %v1064_v62 }
 0x4c6   : > { %1899 = vmatprep.subr.bf16.mxu0 %v2254_v14  ;;  %v1053_v1 = vmul.f32 %v2076_v63, %v2068_v43 }
 0x4c8   : > { %v1054_v3 = vpack.c.bf16 %v1053_v1, %v1053_v1 }
 0x4ca   : > { %1890 = vmatmul.mubr.msk.bf16.vlgmr.msra.gmra.mxu0 %vm878_vm3, %v1054_v3  ;;  %v2058_v3 = vld [vmem:[%s2690_s15 + $0x10] sm:$0xff]  }
 0x4cb   : > { %1900 = vmatpush3.bf16.msra.mxu0 %v1191_v4  ;;  %1901 = vmatprep.mubr.msk.bf16.mxu0 %vm2255_vm1, %v2254_v14  ;;  %v2059_v4 = vld [vmem:[%s2690_s15 + $0x8] sm:$0xff]  }
 0x4cc   : > { %1911 = vmatprep.subr.bf16.mxu0 %v2254_v14 }
 0x4cd   : > { %v2078_v5 = vpop.eup %2077 }
 0x4ce   : > { %v1180_v6 = vmul.f32 %v2078_v5, %v2070_v45  ;;  %v2060_v5 = vld [vmem:[%s2690_s15] sm:$0xff]  }
 0x4d0   : > { %v1181_v7 = vpack.c.bf16 %v1180_v6, %v1180_v6  ;;  %v1792_v6 = vld [vmem:[%s2689_s14] ss:$0 sm:$0xff] }
 0x4d2   : > { %1902 = vmatmul.mubr.msk.bf16.vlgmr.msra.gmra.mxu0 %vm878_vm3, %v1181_v7 }
 0x4d3   : > { %1913 = vmatprep.mubr.msk.bf16.mxu0 %vm2255_vm1, %v2254_v14 }
 0x4ec   : > { %v1305_v8 = vpop.xlane.xlu1 %1304 }
 0x4ed   : > { %2079 = vrcp.f32 %v1305_v8 }
 0x4f0   : > { %v1313_v9 = vpop.permute.xlu1 %1312 }
 0x4f1   : > { %v1318_v10 = vsel %vm940_vm4, %v1313_v9, 0 }
 0x4f2   : > { %1912 = vmatpush3.bf16.msra.mxu0 %v1318_v10 }
 0x4f3   : > { %1925 = vmatprep.subr.bf16.mxu0 %v2254_v14 }
 0x4fa   : > { %v2080_v11 = vpop.eup %2079 }
 0x4fb   : > { %v1307_v12 = vmul.f32 %v2080_v11, %v2074_v56 }
 0x4fd   : > { %v1308_v13 = vpack.c.bf16 %v1307_v12, %v1307_v12 }
 0x4ff   : > { %1914 = vmatmul.mubr.msk.bf16.vlgmr.msra.gmra.mxu0 %vm878_vm3, %v1308_v13 }
 0x500   : > { %1929 = vmatprep.mubr.msk.bf16.mxu0 %vm2255_vm1, %v2254_v14  ;;  %1926 = vmatpush3.bf16.msra.mxu0 %v2055_v54 }
 0x501   : > { %1927 = vmatprep.subr.bf16.mxu0 %v2254_v14 }
 0x504   : > { %1928 = vmatpush3.bf16.msra.mxu0 %v2056_v55 }
 0x515   : > { %v978_v15 = vpop.f32.mrf.mxu0 }
 0x516   : > { %v984_v16 = vpack.c.bf16 %v978_v15, %v978_v15 }
 0x517   : > { %v1879_v17 = vpop.f32.mrf.mxu0 }
 0x518   : > { %986 = vst.msk [vmem:[#allocation4] sm:$0xf] %vm985_vm5, %v984_v16 }
 0x519   : > { %v981_v18 = vpop.f32.mrf.mxu0 }
 0x51a   : > { %v1796_v18 = vld [vmem:[%s2691_s16] ss:$0 sm:$0xff] }
 0x51b   : > { %v1880_v19 = vpop.f32.mrf.mxu0 }
 0x58a   : > { %v1100_v20 = vpop.f32.mrf.mxu0 }
 0x58b   : > { %v1806_v21 = vpack.c.bf16 %v1100_v20, %v1100_v20 }
 0x58c   : > { %v1891_v22 = vpop.f32.mrf.mxu0 }
 0x58d   : > { %1110 = vrot.lane.b32.xlu1 %v1806_v21, %s2259_s30  ;;  %s597_s30 = scalar_lea.vmem [#allocation11], %s1751_s28  ;;  %s2167_s28 = sshll.u32 %s2262_s21, 4  ;;  %s2168_s28 = int_to_ptr.vmem [resolvable:$false] %s2167_s28 }
 0x58e   : > { %v1103_v23 = vpop.f32.mrf.mxu0  ;;  %s2169_s18 = scalar_lea.vmem %s2168_s28, 256 }
 0x590   : > { %v1892_v24 = vpop.f32.mrf.mxu0 }
 0x592   : > { %v1227_v25 = vpop.f32.mrf.mxu0 }
 0x593   : > { %v1807_v26 = vpack.c.bf16 %v1227_v25, %v1227_v25 }
 0x594   : > { %v1903_v27 = vpop.f32.mrf.mxu0 }
 0x595   : > { %1237 = vrot.lane.b32.xlu0 %v1807_v26, %s2260_s0  ;;  %s1639_s0 = sshll.u32 %s597_s30, 4  ;;  %s2630_s0 = int_to_ptr.vmem [resolvable:$true] %s1639_s0 }
 0x596   : > { %v1230_v28 = vpop.f32.mrf.mxu0  ;;  %s2163_s19 = scalar_lea.vmem %s2630_s0, 128  ;;  %p2170_p3 = scmp.lt.s32.totalorder %s2630_s0, %s2168_s28 }
 0x597   : > { %p2164_p10 = scmp.ne.s32.totalorder %s2630_s0, %s2163_s19  ;;  %p2171_p6 = scmp.lt.s32.totalorder %s2169_s18, %s2163_s19 }
 0x598   : > { %v1904_v29 = vpop.f32.mrf.mxu0 }
 0x599   : > { %p2165_p11 = pnand %p2164_p10, %p2393_p4  ;;  %p2172_p7 = por %p2171_p6, %p2170_p3 }
 0x59b   : > { %p2166_p13 = pneg %p2165_p11 }
 0x59d   : > { %p2173_p9 = pnand %p2172_p7, %p2166_p13 }
 0x5bf   : > { %v1354_v32 = vpop.f32.mrf.mxu0 }
 0x5c0   : > { %v1808_v33 = vpack.c.bf16 %v1354_v32, %v1354_v32 }
 0x5c1   : > { %v1915_v34 = vpop.f32.mrf.mxu0 }
 0x5c2   : > { %1364 = vrot.lane.b32.xlu1 %v1808_v33, %s2261_s24 }
 0x5c3   : > { %v1357_v35 = vpop.f32.mrf.mxu0 }
 0x5c5   : > { %v1916_v36 = vpop.f32.mrf.mxu0 }
 0x5ff   : > { %v1111_v37 = vpop.permute.xlu1 %1110 }
 0x600   : > { %1114 = vst.msk [vmem:[#allocation4] sm:$0xf] %vm1113_vm6, %v1111_v37 }
 0x607   : > { %v1238_v38 = vpop.permute.xlu0 %1237 }
 0x608   : > { %1241 = vst.msk [vmem:[#allocation4] sm:$0xf] %vm1240_vm7, %v1238_v38 }
 0x634   : > { %v1365_v39 = vpop.permute.xlu1 %1364 }
 0x635   : > { %1368 = vst.msk [vmem:[#allocation4] sm:$0xf] %vm1367_vm8, %v1365_v39 }
 0x63c   : > { %v1369_v40 = vld [vmem:[#allocation4] sm:$0xf] }
 0x63d   : > { %1922 = vmatmul.mubr.msk.bf16.vlgmr.msra.gmra.mxu1 %vm610_vm0, %v1369_v40 }
 0x63e   : > { %1941 = vmatprep.mubr.msk.bf16.mxu1 %vm2255_vm1, %v2254_v14  ;;  %1934 = vmatpush3.bf16.msra.mxu1 %v2057_v2 }
 0x63f   : > { %1935 = vmatprep.subr.bf16.mxu1 %v2254_v14 }
 0x642   : > { %1936 = vmatpush3.bf16.msra.mxu1 %v2058_v3 }
 0x643   : > { %1937 = vmatprep.subr.bf16.mxu1 %v2254_v14 }
 0x646   : > { %1938 = vmatpush3.bf16.msra.mxu1 %v2059_v4 }
 0x647   : > { %1939 = vmatprep.subr.bf16.mxu1 %v2254_v14 }
 0x64a   : > { %1940 = vmatpush3.bf16.msra.mxu1 %v2060_v5 }
 0x6fd   : > { %v1430_v42 = vpop.f32.mrf.mxu1 }
 0x6fe   : > { %v1431_v43 = vadd.f32 %v1786_v41, %v1430_v42 }
 0x6ff   : > { %v1923_v44 = vpop.f32.mrf.mxu1 }
 0x700   : > { %v2587_v45 = vadd.f32 %v1431_v43, %v2465_v0 }
 0x701   : > { %v1433_v46 = vpop.f32.mrf.mxu1 }
 0x702   : > { %v1439_v47 = vsel %vm610_vm0, %v2587_v45, 0.0 }
 0x703   : > { %1440 = vadd.xlane.f32.xlu0 %v1439_v47  ;;  %v1924_v48 = vpop.f32.mrf.mxu1 }
 0x78c   : > { %v1441_v49 = vpop.xlane.xlu0 %1440 }
 0x78d   : > { %v1442_v50 = vmul.f32 0.03125, %v1441_v49 }
 0x78f   : > { %v1443_v51 = vsub.f32 %v2587_v45, %v1442_v50 }
 0x791   : > { %v1444_v52 = vmul.f32 %v1443_v51, %v1443_v51 }
 0x793   : > { %v1445_v53 = vsel %vm610_vm0, %v1444_v52, 0.0 }
 0x794   : > { %1446 = vadd.xlane.f32.xlu1 %v1445_v53 }
 0x81d   : > { %v1447_v0 = vpop.xlane.xlu1 %1446 }
 0x81e   : > { %v1448_v56 = vmul.f32 0.03125, %v1447_v0 }
 0x820   : > { %v1449_v57 = vadd.f32 1e-05, %v1448_v56 }
 0x822   : > { %2081 = vrsqrt.f32 %v1449_v57 }
 0x82f   : > { %v2082_v58 = vpop.eup %2081 }
 0x830   : > { %v1451_v60 = vmul.f32 %v2082_v58, %v1443_v51 }
 0x832   : > { %v1458_v62 = vmul.f32 %v1790_v59, %v1451_v60 }
 0x834   : > { %v1465_v63 = vadd.f32 %v1791_v61, %v1458_v62 }
 0x836   : > { %v1466_v1 = vpack.c.bf16 %v1465_v63, %v1465_v63 }
 0x838   : > { %1930 = vmatmul.mubr.msk.bf16.vlgmr.msra.gmra.mxu0 %vm610_vm0, %v1466_v1 }
 0x8f8   : > { %v1527_v7 = vpop.f32.mrf.mxu0 }
 0x8f9   : > { %v1528_v8 = vadd.f32 %v1792_v6, %v1527_v7 }
 0x8fa   : > { %v1931_v9 = vpop.f32.mrf.mxu0 }
 0x8fb   : > { %v1534_v10 = vmul.f32 0.70710677, %v1528_v8  ;;  %v1533_v14 = vmul.f32 0.5, %v1528_v8 }
 0x8fc   : > { %v1530_v11 = vpop.f32.mrf.mxu0 }
 0x8fd   : > { %2083 = verf.f32 %v1534_v10 }
 0x8fe   : > { %v1932_v12 = vpop.f32.mrf.mxu0 }
 0x90a   : > { %v2084_v13 = vpop.eup %2083 }
 0x90b   : > { %v1536_v15 = vadd.f32 1.0, %v2084_v13 }
 0x90d   : > { %v1537_v16 = vmul.f32 %v1536_v15, %v1533_v14 }
 0x90f   : > { %v1538_v17 = vpack.c.bf16 %v1537_v16, %v1537_v16 }
 0x911   : > { %1942 = vmatmul.mubr.msk.bf16.vlgmr.msra.gmra.mxu1 %vm1578_vm9, %v1538_v17 }
 0x9d1   : > { %v1616_v19 = vpop.f32.mrf.mxu1 }
 0x9d2   : > { %v1617_v20 = vadd.f32 %v1796_v18, %v1616_v19 }
 0x9d3   : > { %v1943_v21 = vpop.f32.mrf.mxu1 }
 0x9d4   : > { %v1622_v22 = vadd.f32 %v1617_v20, %v2587_v45 }
 0x9d5   : > { %v1619_v23 = vpop.f32.mrf.mxu1 }
 0x9d6   : > { %1623 = vst.msk [vmem:[%s597_s30] sm:$0xff] %vm610_vm0, %v1622_v22 }
 0x9d7   : > { %v1944_v24 = vpop.f32.mrf.mxu1 }
 0x9d8   : > { %2176 = shalt.err (!%p2173_p9)
}
 0x9d9   : > { %s2177_s22 = scalar_lea.hbm %s2628_s20, 128  ;;  %s2181_s30 = scalar_lea.hbm %s2692_s17, 256 }
 0x9da   : > { %p2178_p12 = scmp.ne.s32.totalorder %s2628_s20, %s2177_s22  ;;  %p2182_p2 = scmp.lt.s32.totalorder %s2628_s20, %s2692_s17 }
 0x9db   : > { %p2183_p5 = scmp.lt.s32.totalorder %s2181_s30, %s2177_s22 }
 0x9dc   : > { %p2179_p1 = pnand %p2178_p12, %p2393_p4 }
 0x9dd   : > { %p2184_p0 = por %p2183_p5, %p2182_p2 }
 0x9de   : > { %p2180_p8 = pneg %p2179_p1 }
 0x9e0   : > { %p2185_p10 = pnand %p2184_p0, %p2180_p8 }
 0x9e2   : > { %2188 = shalt.err (!%p2185_p10)
}
 0x9e3   : > { %1957 = dma.vmem_to_hbm [thread:$0]  (%p2393_p4), %s2630_s0, 128, %s2628_s20, %s1625_s27  }
 0x9e4 PF: > { %s2716_s19 = sld [smem:[#allocation18_spill]] }
 0x9e5   : > { %s2717_s21 = sld [smem:[#allocation15_spill]] }
 0x9e6   : > { %s2718_s28 = sld [smem:[#allocation20_spill]] }
 0x9ea   : > { %p1979_p11 = scmp.ge.s32.totalorder %s2716_s19, 2 }
 0x9eb   : > { %s1651_s18 = sand.u32 1, %s2717_s21  }
 0x9ec   : > { %p2719_p13 = scmp.ne.s32.totalorder %s2718_s28, 0  ;;  %s1652_s29 = scalar_lea.sflag [#allocation7], %s1651_s18 }
 0x9ee   : > { %p1970_p3 = pnand %p1979_p11, %p2719_p13 }
 0x9f0   : > { %p1971_p6 = pneg %p1970_p3 }
 0x9f2   : > { %2222 = dma.done.wait (%p1971_p6), %s1652_s29, 128  }
 0x9f3   : > { %2224 = vsyncadd (%p1971_p6), %s1652_s29, 4294967168  ;;  %s32_s29 = sadd.s32 1, %s2716_s19   ;;  %s2720_s1 = sld [smem:[#allocation16_spill]] }
 0x9f4   : > { %p29_p7 = scmp.ge.s32.totalorder %s32_s29, 4   ;;  %s2721_s26 = sld [smem:[#allocation21_spill]] }
 0x9f5   : > { %s2722_s27 = sld [smem:[#allocation17_spill]]  ;;  %s2724_s24 = smov %s2231_s25 }
 0x9f6   : > { %s2723_s28 = sld [smem:[#allocation19_spill]]  ;;  %31 = sbr.rel (!%p29_p7) target bundleno = 9 (0x9), region = 141 }
 0x9f9   : > { %s2725_s25 = smov %s2720_s1 }
 0x9fb   :  { %1657 = vsyncpa [#allocation6], 1 }
 0x9fc   :  { %1659 = vsyncpa [#allocation6 + $0x1], 1 }
 0x9fd   :  { %1660 = vsyncpa [#allocation9], 1 }
 0x9fe   :  { %1661 = vsyncpa [#allocation7], 1 }
 0x9ff   :  { %1663 = vsyncpa [#allocation7 + $0x1], 1 }

</bundles_post_ra>
